<compile_context>
chip_gen: v5e
topology: v5e:2x2
jax: 0.10.0
libtpu: 0.0.40
codegen_flags: <defaults>
</compile_context>

<pallas_src>
import functools

import jax
import jax.numpy as jnp
from jax.experimental import pallas as pl
from jax.experimental.pallas import tpu as pltpu


def self_attention_kernel(x_ref, wqkv_ref, wproj_ref, bproj_ref, o_ref,
                          heads_ref, *, num_heads, head_dim,
                          samples_per_block, seq_len):
    H, D, TB, N = num_heads, head_dim, samples_per_block, seq_len
    C = H * D
    M = TB * N  # rows processed this grid step

    # ---- QKV projection: one big (M, C) @ (C, 3C) matmul, f32 accumulation.
    x = x_ref[...]                                                    # (M, C) bf16
    qkv = jnp.dot(x, wqkv_ref[...],
                  preferred_element_type=jnp.float32)                 # (M, 3C) f32
    # Single full-width cast to bf16, then a per-sample view.
    qkv = qkv.astype(jnp.bfloat16).reshape(TB, N, 3 * C)

    # ---- Per-head attention, batched over the TB samples in this block.
    # Each head's output is staged into the bf16 scratch at its column slab;
    # the output projection happens once after the head loop (K = C depth).
    for h in range(H):
        qh = qkv[:, :, h * D:(h + 1) * D]                             # (TB,N,D) pre-scaled
        kh = qkv[:, :, C + h * D:C + (h + 1) * D]                     # (TB,N,D)
        vh = qkv[:, :, 2 * C + h * D:2 * C + (h + 1) * D]             # (TB,N,D)

        # Scores: contract the trailing dim directly (no explicit transpose).
        s = jnp.einsum('bnd,bmd->bnm', qh, kh,
                       preferred_element_type=jnp.float32)            # (TB,N,N) f32
        s = s - jnp.max(s, axis=-1, keepdims=True)
        p = jnp.exp(s)
        p = p * pl.reciprocal(jnp.sum(p, axis=-1, keepdims=True), approx=True)

        oh = jnp.einsum('bnm,bmd->bnd', p.astype(jnp.bfloat16), vh,
                        preferred_element_type=jnp.float32)           # (TB,N,D) f32

        heads_ref[:, h * D:(h + 1) * D] = (
            oh.reshape(M, D).astype(jnp.bfloat16))

    # ---- Single output projection: (M, C) @ (C, C), f32 accumulation, +bias.
    out = jnp.dot(heads_ref[...], wproj_ref[...],
                  preferred_element_type=jnp.float32)                 # (M, C) f32
    o_ref[...] = (out + bproj_ref[...]).astype(o_ref.dtype)


# ---------------------------------------------------------------------------
# Wrapper-side tiling / generation heuristics.
# ---------------------------------------------------------------------------

def _tpu_generation_budget():
    """Returns (row_target, vmem_limit_bytes, prefer_multi_step)."""
    vmem_cap = None
    try:
        info = pltpu.get_tpu_info()
        vmem_cap = getattr(info, "vmem_capacity_bytes", None)
    except Exception:
        vmem_cap = None
    if vmem_cap is not None and int(vmem_cap) >= 100 * 1024 * 1024:
        # v5e / v6e: 128 MiB physical VMEM, single TensorCore per chip.
        return 1024, 96 * 1024 * 1024, False
    # v7x (64 MiB / TC, 2 TCs) or unknown: conservative scoped VMEM and make
    # sure the grid has >= 2 steps so "parallel" shards across both cores.
    return 512, 48 * 1024 * 1024, True


def _choose_samples_per_block(BT, N, C, out_itemsize, row_target, vmem_budget,
                              prefer_multi_step):
    divisors = [d for d in range(1, BT + 1) if BT % d == 0]

    def sublane_ok(d):
        # (8,128) rule on the (tb*N, C) block: row dim must be a multiple of 8
        # unless the block covers the whole flattened row dimension.
        return (d * N) % 8 == 0 or d == BT

    def block_bytes(d):
        m = d * N
        return (m * C * 2 * 2                 # x slab, bf16, double-buffered
                + m * C * out_itemsize * 2    # out slab, double-buffered
                + m * 3 * C * (4 + 2)         # qkv f32 result + bf16 copy
                + m * C * 2                   # head-output staging (bf16)
                + 2 * d * N * N * 4)          # scores / probs (f32, per head)

    cands = [d for d in divisors
             if sublane_ok(d) and block_bytes(d) <= vmem_budget]
    if not cands:
        cands = [d for d in divisors if sublane_ok(d)] or [BT]
    if prefer_multi_step and BT > 1:
        multi = [d for d in cands if d <= BT // 2]
        if multi:
            cands = multi
    under = [d for d in cands if d * N <= row_target]
    return max(under) if under else min(cands)


_USE_SINGLE_BUFFERED_WEIGHTS = None  # resolved on first call (fallback-safe)


def self_attention(x, w_qkv_t, w_proj_t, b_proj, num_heads, *,
                   samples_per_block=None):
    """x: (B, T, N, C). w_qkv_t: (C, 3C) = W_qkv^T. w_proj_t: (C, C) = W_proj^T.
    b_proj: (1, C). Returns (B, T, N, C) in x.dtype."""
    global _USE_SINGLE_BUFFERED_WEIGHTS

    B, T, N, C = x.shape
    assert C % num_heads == 0, "dim should be divisible by num_heads"
    head_dim = C // num_heads
    scale = head_dim ** (-0.5)
    BT = B * T

    # Fold the softmax scale into the Q columns of W_qkv^T once (outside the
    # hot loop) and cast the big weights to bf16 for the MXU.
    w_qkv = (w_qkv_t.astype(jnp.float32)
             .at[:, :C].multiply(scale)
             .astype(jnp.bfloat16))
    w_proj = w_proj_t.astype(jnp.bfloat16)
    bias = b_proj.reshape(1, C).astype(jnp.float32)

    row_target, vmem_limit, prefer_multi = _tpu_generation_budget()
    out_itemsize = jnp.dtype(x.dtype).itemsize

    if samples_per_block is None:
        # Leave room for the (possibly double-buffered) weights + slack.
        weight_bytes = 2 * ((C * 3 * C + C * C) * 2 + C * 4)
        budget = max(vmem_limit - weight_bytes - (4 << 20), vmem_limit // 4)
        tb = _choose_samples_per_block(BT, N, C, out_itemsize, row_target,
                                       budget, prefer_multi)
    else:
        tb = samples_per_block
        assert BT % tb == 0, "samples_per_block must divide B*T"
        assert (tb * N) % 8 == 0 or tb == BT, \
            "block rows (tb*N) must be a multiple of 8 (or cover all rows)"

    grid = (BT // tb,)
    m_blk = tb * N

    # Feed x in bf16 (MXU consumes bf16 anyway); output stays in x.dtype.
    x_flat = x.reshape(BT * N, C).astype(jnp.bfloat16)

    # Advisory cost estimate so XLA schedules around the custom call sensibly.
    flops = BT * (2 * N * C * 3 * C + 4 * N * N * C + 2 * N * C * C)
    bytes_accessed = (x_flat.size * 2 + BT * N * C * out_itemsize
                      + w_qkv.size * 2 + w_proj.size * 2 + bias.size * 4)
    cost = pl.CostEstimate(flops=int(flops),
                           transcendentals=int(BT * num_heads * N * N),
                           bytes_accessed=int(bytes_accessed))

    kernel = functools.partial(self_attention_kernel,
                               num_heads=num_heads,
                               head_dim=head_dim,
                               samples_per_block=tb,
                               seq_len=N)

    def build(single_buffer_weights):
        if single_buffer_weights:
            def wspec(shape):
                return pl.BlockSpec(shape, lambda i: (0, 0),
                                    pipeline_mode=pl.Buffered(1))
        else:
            def wspec(shape):
                return pl.BlockSpec(shape, lambda i: (0, 0))
        return pl.pallas_call(
            kernel,
            out_shape=jax.ShapeDtypeStruct((BT * N, C), x.dtype),
            grid_spec=pltpu.PrefetchScalarGridSpec(
                num_scalar_prefetch=0,
                grid=grid,
                in_specs=[
                    pl.BlockSpec((m_blk, C), lambda i: (i, 0)),   # x row-slab
                    wspec((C, 3 * C)),                            # W_qkv^T (invariant)
                    wspec((C, C)),                                # W_proj^T (invariant)
                    wspec((1, C)),                                # b_proj (invariant)
                ],
                out_specs=pl.BlockSpec((m_blk, C), lambda i: (i, 0)),
                scratch_shapes=[pltpu.VMEM((m_blk, C), jnp.bfloat16)],
            ),
            compiler_params=pltpu.CompilerParams(
                dimension_semantics=("parallel",),       # independent sample blocks
                vmem_limit_bytes=vmem_limit),
            cost_estimate=cost,
        )

    args = (x_flat, w_qkv, w_proj, bias)
    if _USE_SINGLE_BUFFERED_WEIGHTS is None:
        try:
            out_flat = build(True)(*args)
            _USE_SINGLE_BUFFERED_WEIGHTS = True
        except Exception:
            # This JAX build rejects pipeline_mode on top-level pallas_call
            # BlockSpecs; fall back to default (double-buffered) weights.
            _USE_SINGLE_BUFFERED_WEIGHTS = False
            out_flat = build(False)(*args)
    else:
        out_flat = build(_USE_SINGLE_BUFFERED_WEIGHTS)(*args)

    return out_flat.reshape(B, T, N, C)


def self_attention_reference(x, w_qkv_t, w_proj_t, b_proj, num_heads):
    """Plain-JAX f32 reference mirroring the PyTorch forward."""
    B, T, N, C = x.shape
    head_dim = C // num_heads
    x2 = x.reshape(B * T, N, C)
    qkv = x2 @ w_qkv_t
    q, k, v = qkv[..., :C], qkv[..., C:2 * C], qkv[..., 2 * C:]

    def split_heads(a):
        return a.reshape(B * T, N, num_heads, head_dim).transpose(0, 2, 1, 3)

    q, k, v = split_heads(q), split_heads(k), split_heads(v)
    q = q * (head_dim ** (-0.5))
    attn = jax.nn.softmax(q @ jnp.swapaxes(k, -1, -2), axis=-1)
    o = (attn @ v).transpose(0, 2, 1, 3).reshape(B, T, N, C)
    return o @ w_proj_t + b_proj.reshape(C)


if __name__ == "__main__":
    # Small shapes consistent with the module (dim divisible by num_heads).
    B, T, N = 2, 2, 8
    num_heads, head_dim = 4, 8
    C = num_heads * head_dim                                        # dim = 32

    key = jax.random.PRNGKey(0)
    k1, k2, k3, k4 = jax.random.split(key, 4)
    x = jax.random.normal(k1, (B, T, N, C), dtype=jnp.float32)
    # PyTorch Linear stores (out, in); we pre-transpose so kernels do x @ W^T.
    w_qkv_t = 0.05 * jax.random.normal(k2, (C, 3 * C), dtype=jnp.float32)
    w_proj_t = 0.05 * jax.random.normal(k3, (C, C), dtype=jnp.float32)
    b_proj = 0.05 * jax.random.normal(k4, (1, C), dtype=jnp.float32)

    ref = self_attention_reference(x, w_qkv_t, w_proj_t, b_proj, num_heads)

    # Default (generation-aware) tiling.
    out = self_attention(x, w_qkv_t, w_proj_t, b_proj, num_heads)
    out = jax.block_until_ready(out)
    assert out.shape == (B, T, N, C)
    # bf16 MXU operands with f32 accumulation -> bf16-appropriate tolerance.
    assert jnp.allclose(out, ref, atol=2e-2, rtol=2e-2), "mismatch vs reference"

    # Exercise the multi-block (grid > 1) path as well.
    out2 = self_attention(x, w_qkv_t, w_proj_t, b_proj, num_heads,
                          samples_per_block=2)
    out2 = jax.block_until_ready(out2)
    assert jnp.allclose(out2, ref, atol=2e-2, rtol=2e-2), "mismatch (tiled)"

    # TODO(synk): attn_drop / proj_drop with p>0 (training mode) would need
    # pltpu.prng_seed + stateful_bernoulli; omitted since defaults are 0.0.
    print("KERNEL_OK")
</pallas_src>

<mosaic_0001>
module attributes {stable_mosaic.version = 11 : i64} {
  func.func @self_attention_kernel(%arg0: i32, %arg1: memref<16x32xbf16, #tpu.memory_space<vmem>>, %arg2: memref<32x96xbf16, #tpu.memory_space<vmem>>, %arg3: memref<32x32xbf16, #tpu.memory_space<vmem>>, %arg4: memref<1x32xf32, #tpu.memory_space<vmem>>, %arg5: memref<16x32xf32, #tpu.memory_space<vmem>>, %arg6: memref<16x32xbf16, #tpu.memory_space<vmem>>) attributes {dimension_semantics = [#tpu.dimension_semantics<parallel>], iteration_bounds = array<i64: 2>, scalar_prefetch = 0 : i64, scratch_operands = 1 : i64, tpu.core_type = #tpu.core_type<tc>, window_params = [{transform_indices = @transform_0, window_bounds = array<i64: 16, 32>}, {pipeline_mode = #tpu.pipeline_mode<synchronous>, transform_indices = @transform_1, window_bounds = array<i64: 32, 96>}, {pipeline_mode = #tpu.pipeline_mode<synchronous>, transform_indices = @transform_2, window_bounds = array<i64: 32, 32>}, {pipeline_mode = #tpu.pipeline_mode<synchronous>, transform_indices = @transform_3, window_bounds = array<i64: 1, 32>}, {transform_indices = @transform_4, window_bounds = array<i64: 16, 32>}]} {
    %c0 = arith.constant 0 : index
    %c0_0 = arith.constant 0 : index
    %0 = vector.load %arg1[%c0, %c0_0] : memref<16x32xbf16, #tpu.memory_space<vmem>>, vector<16x32xbf16>
    %c0_1 = arith.constant 0 : index
    %c0_2 = arith.constant 0 : index
    %1 = vector.load %arg2[%c0_1, %c0_2] : memref<32x96xbf16, #tpu.memory_space<vmem>>, vector<32x96xbf16>
    %cst = arith.constant dense<0.000000e+00> : vector<16x96xf32>
    %2 = tpu.matmul %0, %1, %cst {dimension_numbers = #tpu.dot_dimension_numbers<[1], [0], [0], [1], [0, 0, 1, 1], [], []>} : vector<16x32xbf16>, vector<32x96xbf16>, vector<16x96xf32> -> vector<16x96xf32>
    %3 = arith.truncf %2 : vector<16x96xf32> to vector<16x96xbf16>
    %4 = vector.shape_cast %3 : vector<16x96xbf16> to vector<2x8x96xbf16>
    %5 = vector.extract_strided_slice %4 {offsets = [0, 0, 0], sizes = [2, 8, 8], strides = [1, 1, 1]} : vector<2x8x96xbf16> to vector<2x8x8xbf16>
    %6 = vector.extract_strided_slice %4 {offsets = [0, 0, 32], sizes = [2, 8, 8], strides = [1, 1, 1]} : vector<2x8x96xbf16> to vector<2x8x8xbf16>
    %7 = vector.extract_strided_slice %4 {offsets = [0, 0, 64], sizes = [2, 8, 8], strides = [1, 1, 1]} : vector<2x8x96xbf16> to vector<2x8x8xbf16>
    "tpu.trace_start"() <{level = 10 : i32, message = "bnd,bmd->bnm"}> : () -> ()
    %cst_3 = arith.constant dense<0.000000e+00> : vector<2x8x8xf32>
    %8 = tpu.matmul %5, %6, %cst_3 {dimension_numbers = #tpu.dot_dimension_numbers<[2], [2], [1], [1], [0, 0, 0, 1, 1, 1], [0], [0]>} : vector<2x8x8xbf16>, vector<2x8x8xbf16>, vector<2x8x8xf32> -> vector<2x8x8xf32>
    "tpu.trace_stop"() : () -> ()
    %cst_4 = arith.constant dense<0xFF800000> : vector<2x8xf32>
    %9 = vector.multi_reduction <maximumf>, %8, %cst_4 [2] : vector<2x8x8xf32> to vector<2x8xf32>
    %10 = vector.shape_cast %9 : vector<2x8xf32> to vector<2x8x1xf32>
    %11 = vector.broadcast %10 : vector<2x8x1xf32> to vector<2x8x8xf32>
    %12 = arith.subf %8, %11 : vector<2x8x8xf32>
    %13 = math.exp %12 : vector<2x8x8xf32>
    %cst_5 = arith.constant dense<0.000000e+00> : vector<2x8xf32>
    %14 = vector.multi_reduction <add>, %13, %cst_5 [2] : vector<2x8x8xf32> to vector<2x8xf32>
    %15 = vector.shape_cast %14 : vector<2x8xf32> to vector<2x8x1xf32>
    %16 = tpu.reciprocal %15 {approx = true} : vector<2x8x1xf32> -> vector<2x8x1xf32>
    %17 = vector.broadcast %16 : vector<2x8x1xf32> to vector<2x8x8xf32>
    %18 = arith.mulf %13, %17 : vector<2x8x8xf32>
    %19 = arith.truncf %18 : vector<2x8x8xf32> to vector<2x8x8xbf16>
    "tpu.trace_start"() <{level = 10 : i32, message = "bnm,bmd->bnd"}> : () -> ()
    %cst_6 = arith.constant dense<0.000000e+00> : vector<2x8x8xf32>
    %20 = tpu.matmul %19, %7, %cst_6 {dimension_numbers = #tpu.dot_dimension_numbers<[2], [1], [1], [2], [0, 0, 0, 1, 1, 2], [0], [0]>} : vector<2x8x8xbf16>, vector<2x8x8xbf16>, vector<2x8x8xf32> -> vector<2x8x8xf32>
    "tpu.trace_stop"() : () -> ()
    %21 = vector.shape_cast %20 : vector<2x8x8xf32> to vector<16x8xf32>
    %22 = arith.truncf %21 : vector<16x8xf32> to vector<16x8xbf16>
    %c0_7 = arith.constant 0 : index
    %c0_8 = arith.constant 0 : index
    %23 = vector.load %arg6[%c0_7, %c0_8] : memref<16x32xbf16, #tpu.memory_space<vmem>>, vector<16x8xbf16>
    tpu.vector_store %arg6[%c0_7, %c0_8], %22 {strides = array<i32>} : memref<16x32xbf16, #tpu.memory_space<vmem>>, vector<16x8xbf16>,
    %24 = vector.extract_strided_slice %4 {offsets = [0, 0, 8], sizes = [2, 8, 8], strides = [1, 1, 1]} : vector<2x8x96xbf16> to vector<2x8x8xbf16>
    %25 = vector.extract_strided_slice %4 {offsets = [0, 0, 40], sizes = [2, 8, 8], strides = [1, 1, 1]} : vector<2x8x96xbf16> to vector<2x8x8xbf16>
    %26 = vector.extract_strided_slice %4 {offsets = [0, 0, 72], sizes = [2, 8, 8], strides = [1, 1, 1]} : vector<2x8x96xbf16> to vector<2x8x8xbf16>
    "tpu.trace_start"() <{level = 10 : i32, message = "bnd,bmd->bnm"}> : () -> ()
    %cst_9 = arith.constant dense<0.000000e+00> : vector<2x8x8xf32>
    %27 = tpu.matmul %24, %25, %cst_9 {dimension_numbers = #tpu.dot_dimension_numbers<[2], [2], [1], [1], [0, 0, 0, 1, 1, 1], [0], [0]>} : vector<2x8x8xbf16>, vector<2x8x8xbf16>, vector<2x8x8xf32> -> vector<2x8x8xf32>
    "tpu.trace_stop"() : () -> ()
    %cst_10 = arith.constant dense<0xFF800000> : vector<2x8xf32>
    %28 = vector.multi_reduction <maximumf>, %27, %cst_10 [2] : vector<2x8x8xf32> to vector<2x8xf32>
    %29 = vector.shape_cast %28 : vector<2x8xf32> to vector<2x8x1xf32>
    %30 = vector.broadcast %29 : vector<2x8x1xf32> to vector<2x8x8xf32>
    %31 = arith.subf %27, %30 : vector<2x8x8xf32>
    %32 = math.exp %31 : vector<2x8x8xf32>
    %cst_11 = arith.constant dense<0.000000e+00> : vector<2x8xf32>
    %33 = vector.multi_reduction <add>, %32, %cst_11 [2] : vector<2x8x8xf32> to vector<2x8xf32>
    %34 = vector.shape_cast %33 : vector<2x8xf32> to vector<2x8x1xf32>
    %35 = tpu.reciprocal %34 {approx = true} : vector<2x8x1xf32> -> vector<2x8x1xf32>
    %36 = vector.broadcast %35 : vector<2x8x1xf32> to vector<2x8x8xf32>
    %37 = arith.mulf %32, %36 : vector<2x8x8xf32>
    %38 = arith.truncf %37 : vector<2x8x8xf32> to vector<2x8x8xbf16>
    "tpu.trace_start"() <{level = 10 : i32, message = "bnm,bmd->bnd"}> : () -> ()
    %cst_12 = arith.constant dense<0.000000e+00> : vector<2x8x8xf32>
    %39 = tpu.matmul %38, %26, %cst_12 {dimension_numbers = #tpu.dot_dimension_numbers<[2], [1], [1], [2], [0, 0, 0, 1, 1, 2], [0], [0]>} : vector<2x8x8xbf16>, vector<2x8x8xbf16>, vector<2x8x8xf32> -> vector<2x8x8xf32>
    "tpu.trace_stop"() : () -> ()
    %40 = vector.shape_cast %39 : vector<2x8x8xf32> to vector<16x8xf32>
    %41 = arith.truncf %40 : vector<16x8xf32> to vector<16x8xbf16>
    %c0_13 = arith.constant 0 : index
    %c8 = arith.constant 8 : index
    %42 = vector.load %arg6[%c0_13, %c8] : memref<16x32xbf16, #tpu.memory_space<vmem>>, vector<16x8xbf16>
    tpu.vector_store %arg6[%c0_13, %c8], %41 {strides = array<i32>} : memref<16x32xbf16, #tpu.memory_space<vmem>>, vector<16x8xbf16>,
    %43 = vector.extract_strided_slice %4 {offsets = [0, 0, 16], sizes = [2, 8, 8], strides = [1, 1, 1]} : vector<2x8x96xbf16> to vector<2x8x8xbf16>
    %44 = vector.extract_strided_slice %4 {offsets = [0, 0, 48], sizes = [2, 8, 8], strides = [1, 1, 1]} : vector<2x8x96xbf16> to vector<2x8x8xbf16>
    %45 = vector.extract_strided_slice %4 {offsets = [0, 0, 80], sizes = [2, 8, 8], strides = [1, 1, 1]} : vector<2x8x96xbf16> to vector<2x8x8xbf16>
    "tpu.trace_start"() <{level = 10 : i32, message = "bnd,bmd->bnm"}> : () -> ()
    %cst_14 = arith.constant dense<0.000000e+00> : vector<2x8x8xf32>
    %46 = tpu.matmul %43, %44, %cst_14 {dimension_numbers = #tpu.dot_dimension_numbers<[2], [2], [1], [1], [0, 0, 0, 1, 1, 1], [0], [0]>} : vector<2x8x8xbf16>, vector<2x8x8xbf16>, vector<2x8x8xf32> -> vector<2x8x8xf32>
    "tpu.trace_stop"() : () -> ()
    %cst_15 = arith.constant dense<0xFF800000> : vector<2x8xf32>
    %47 = vector.multi_reduction <maximumf>, %46, %cst_15 [2] : vector<2x8x8xf32> to vector<2x8xf32>
    %48 = vector.shape_cast %47 : vector<2x8xf32> to vector<2x8x1xf32>
    %49 = vector.broadcast %48 : vector<2x8x1xf32> to vector<2x8x8xf32>
    %50 = arith.subf %46, %49 : vector<2x8x8xf32>
    %51 = math.exp %50 : vector<2x8x8xf32>
    %cst_16 = arith.constant dense<0.000000e+00> : vector<2x8xf32>
    %52 = vector.multi_reduction <add>, %51, %cst_16 [2] : vector<2x8x8xf32> to vector<2x8xf32>
    %53 = vector.shape_cast %52 : vector<2x8xf32> to vector<2x8x1xf32>
    %54 = tpu.reciprocal %53 {approx = true} : vector<2x8x1xf32> -> vector<2x8x1xf32>
    %55 = vector.broadcast %54 : vector<2x8x1xf32> to vector<2x8x8xf32>
    %56 = arith.mulf %51, %55 : vector<2x8x8xf32>
    %57 = arith.truncf %56 : vector<2x8x8xf32> to vector<2x8x8xbf16>
    "tpu.trace_start"() <{level = 10 : i32, message = "bnm,bmd->bnd"}> : () -> ()
    %cst_17 = arith.constant dense<0.000000e+00> : vector<2x8x8xf32>
    %58 = tpu.matmul %57, %45, %cst_17 {dimension_numbers = #tpu.dot_dimension_numbers<[2], [1], [1], [2], [0, 0, 0, 1, 1, 2], [0], [0]>} : vector<2x8x8xbf16>, vector<2x8x8xbf16>, vector<2x8x8xf32> -> vector<2x8x8xf32>
    "tpu.trace_stop"() : () -> ()
    %59 = vector.shape_cast %58 : vector<2x8x8xf32> to vector<16x8xf32>
    %60 = arith.truncf %59 : vector<16x8xf32> to vector<16x8xbf16>
    %c0_18 = arith.constant 0 : index
    %c16 = arith.constant 16 : index
    %61 = vector.load %arg6[%c0_18, %c16] : memref<16x32xbf16, #tpu.memory_space<vmem>>, vector<16x8xbf16>
    tpu.vector_store %arg6[%c0_18, %c16], %60 {strides = array<i32>} : memref<16x32xbf16, #tpu.memory_space<vmem>>, vector<16x8xbf16>,
    %62 = vector.extract_strided_slice %4 {offsets = [0, 0, 24], sizes = [2, 8, 8], strides = [1, 1, 1]} : vector<2x8x96xbf16> to vector<2x8x8xbf16>
    %63 = vector.extract_strided_slice %4 {offsets = [0, 0, 56], sizes = [2, 8, 8], strides = [1, 1, 1]} : vector<2x8x96xbf16> to vector<2x8x8xbf16>
    %64 = vector.extract_strided_slice %4 {offsets = [0, 0, 88], sizes = [2, 8, 8], strides = [1, 1, 1]} : vector<2x8x96xbf16> to vector<2x8x8xbf16>
    "tpu.trace_start"() <{level = 10 : i32, message = "bnd,bmd->bnm"}> : () -> ()
    %cst_19 = arith.constant dense<0.000000e+00> : vector<2x8x8xf32>
    %65 = tpu.matmul %62, %63, %cst_19 {dimension_numbers = #tpu.dot_dimension_numbers<[2], [2], [1], [1], [0, 0, 0, 1, 1, 1], [0], [0]>} : vector<2x8x8xbf16>, vector<2x8x8xbf16>, vector<2x8x8xf32> -> vector<2x8x8xf32>
    "tpu.trace_stop"() : () -> ()
    %cst_20 = arith.constant dense<0xFF800000> : vector<2x8xf32>
    %66 = vector.multi_reduction <maximumf>, %65, %cst_20 [2] : vector<2x8x8xf32> to vector<2x8xf32>
    %67 = vector.shape_cast %66 : vector<2x8xf32> to vector<2x8x1xf32>
    %68 = vector.broadcast %67 : vector<2x8x1xf32> to vector<2x8x8xf32>
    %69 = arith.subf %65, %68 : vector<2x8x8xf32>
    %70 = math.exp %69 : vector<2x8x8xf32>
    %cst_21 = arith.constant dense<0.000000e+00> : vector<2x8xf32>
    %71 = vector.multi_reduction <add>, %70, %cst_21 [2] : vector<2x8x8xf32> to vector<2x8xf32>
    %72 = vector.shape_cast %71 : vector<2x8xf32> to vector<2x8x1xf32>
    %73 = tpu.reciprocal %72 {approx = true} : vector<2x8x1xf32> -> vector<2x8x1xf32>
    %74 = vector.broadcast %73 : vector<2x8x1xf32> to vector<2x8x8xf32>
    %75 = arith.mulf %70, %74 : vector<2x8x8xf32>
    %76 = arith.truncf %75 : vector<2x8x8xf32> to vector<2x8x8xbf16>
    "tpu.trace_start"() <{level = 10 : i32, message = "bnm,bmd->bnd"}> : () -> ()
    %cst_22 = arith.constant dense<0.000000e+00> : vector<2x8x8xf32>
    %77 = tpu.matmul %76, %64, %cst_22 {dimension_numbers = #tpu.dot_dimension_numbers<[2], [1], [1], [2], [0, 0, 0, 1, 1, 2], [0], [0]>} : vector<2x8x8xbf16>, vector<2x8x8xbf16>, vector<2x8x8xf32> -> vector<2x8x8xf32>
    "tpu.trace_stop"() : () -> ()
    %78 = vector.shape_cast %77 : vector<2x8x8xf32> to vector<16x8xf32>
    %79 = arith.truncf %78 : vector<16x8xf32> to vector<16x8xbf16>
    %c0_23 = arith.constant 0 : index
    %c24 = arith.constant 24 : index
    %80 = vector.load %arg6[%c0_23, %c24] : memref<16x32xbf16, #tpu.memory_space<vmem>>, vector<16x8xbf16>
    tpu.vector_store %arg6[%c0_23, %c24], %79 {strides = array<i32>} : memref<16x32xbf16, #tpu.memory_space<vmem>>, vector<16x8xbf16>,
    %c0_24 = arith.constant 0 : index
    %c0_25 = arith.constant 0 : index
    %81 = vector.load %arg6[%c0_24, %c0_25] : memref<16x32xbf16, #tpu.memory_space<vmem>>, vector<16x32xbf16>
    %c0_26 = arith.constant 0 : index
    %c0_27 = arith.constant 0 : index
    %82 = vector.load %arg3[%c0_26, %c0_27] : memref<32x32xbf16, #tpu.memory_space<vmem>>, vector<32x32xbf16>
    %cst_28 = arith.constant dense<0.000000e+00> : vector<16x32xf32>
    %83 = tpu.matmul %81, %82, %cst_28 {dimension_numbers = #tpu.dot_dimension_numbers<[1], [0], [0], [1], [0, 0, 1, 1], [], []>} : vector<16x32xbf16>, vector<32x32xbf16>, vector<16x32xf32> -> vector<16x32xf32>
    %c0_29 = arith.constant 0 : index
    %c0_30 = arith.constant 0 : index
    %84 = vector.load %arg4[%c0_29, %c0_30] : memref<1x32xf32, #tpu.memory_space<vmem>>, vector<1x32xf32>
    %85 = vector.broadcast %84 : vector<1x32xf32> to vector<16x32xf32>
    %86 = arith.addf %83, %85 : vector<16x32xf32>
    %c0_31 = arith.constant 0 : index
    %c0_32 = arith.constant 0 : index
    %87 = vector.load %arg5[%c0_31, %c0_32] : memref<16x32xf32, #tpu.memory_space<vmem>>, vector<16x32xf32>
    tpu.vector_store %arg5[%c0_31, %c0_32], %86 {strides = array<i32>} : memref<16x32xf32, #tpu.memory_space<vmem>>, vector<16x32xf32>,
    return
  }
  func.func @transform_0(%arg0: i32) -> (i32, i32) {
    %c0_i32 = arith.constant 0 : i32
    %c0_i32_0 = arith.constant 0 : i32
    return %arg0, %c0_i32 : i32, i32
  }
  func.func @transform_1(%arg0: i32) -> (i32, i32) {
    %c0_i32 = arith.constant 0 : i32
    %c0_i32_0 = arith.constant 0 : i32
    %c0_i32_1 = arith.constant 0 : i32
    return %c0_i32, %c0_i32_0 : i32, i32
  }
  func.func @transform_2(%arg0: i32) -> (i32, i32) {
    %c0_i32 = arith.constant 0 : i32
    %c0_i32_0 = arith.constant 0 : i32
    %c0_i32_1 = arith.constant 0 : i32
    return %c0_i32, %c0_i32_0 : i32, i32
  }
  func.func @transform_3(%arg0: i32) -> (i32, i32) {
    %c0_i32 = arith.constant 0 : i32
    %c0_i32_0 = arith.constant 0 : i32
    %c0_i32_1 = arith.constant 0 : i32
    return %c0_i32, %c0_i32_0 : i32, i32
  }
  func.func @transform_4(%arg0: i32) -> (i32, i32) {
    %c0_i32 = arith.constant 0 : i32
    %c0_i32_0 = arith.constant 0 : i32
    return %arg0, %c0_i32 : i32, i32
  }
}

module attributes {stable_mosaic.version = 11 : i64} {
  func.func @self_attention_kernel(%arg0: i32, %arg1: memref<16x32xbf16, #tpu.memory_space<vmem>>, %arg2: memref<32x96xbf16, #tpu.memory_space<vmem>>, %arg3: memref<32x32xbf16, #tpu.memory_space<vmem>>, %arg4: memref<1x32xf32, #tpu.memory_space<vmem>>, %arg5: memref<16x32xf32, #tpu.memory_space<vmem>>, %arg6: memref<16x32xbf16, #tpu.memory_space<vmem>>) attributes {dimension_semantics = [#tpu.dimension_semantics<parallel>], iteration_bounds = array<i64: 2>, scalar_prefetch = 0 : i64, scratch_operands = 1 : i64, tpu.core_type = #tpu.core_type<tc>, window_params = [{transform_indices = @transform_0, window_bounds = array<i64: 16, 32>}, {pipeline_mode = #tpu.pipeline_mode<synchronous>, transform_indices = @transform_1, window_bounds = array<i64: 32, 96>}, {pipeline_mode = #tpu.pipeline_mode<synchronous>, transform_indices = @transform_2, window_bounds = array<i64: 32, 32>}, {pipeline_mode = #tpu.pipeline_mode<synchronous>, transform_indices = @transform_3, window_bounds = array<i64: 1, 32>}, {transform_indices = @transform_4, window_bounds = array<i64: 16, 32>}]} {
    %c0 = arith.constant 0 : index
    %c0_0 = arith.constant 0 : index
    %0 = vector.load %arg1[%c0, %c0_0] : memref<16x32xbf16, #tpu.memory_space<vmem>>, vector<16x32xbf16>
    %c0_1 = arith.constant 0 : index
    %c0_2 = arith.constant 0 : index
    %1 = vector.load %arg2[%c0_1, %c0_2] : memref<32x96xbf16, #tpu.memory_space<vmem>>, vector<32x96xbf16>
    %cst = arith.constant dense<0.000000e+00> : vector<16x96xf32>
    %2 = tpu.matmul %0, %1, %cst {dimension_numbers = #tpu.dot_dimension_numbers<[1], [0], [0], [1], [0, 0, 1, 1], [], []>} : vector<16x32xbf16>, vector<32x96xbf16>, vector<16x96xf32> -> vector<16x96xf32>
    %3 = arith.truncf %2 : vector<16x96xf32> to vector<16x96xbf16>
    %4 = vector.shape_cast %3 : vector<16x96xbf16> to vector<2x8x96xbf16>
    %5 = vector.extract_strided_slice %4 {offsets = [0, 0, 0], sizes = [2, 8, 8], strides = [1, 1, 1]} : vector<2x8x96xbf16> to vector<2x8x8xbf16>
    %6 = vector.extract_strided_slice %4 {offsets = [0, 0, 32], sizes = [2, 8, 8], strides = [1, 1, 1]} : vector<2x8x96xbf16> to vector<2x8x8xbf16>
    %7 = vector.extract_strided_slice %4 {offsets = [0, 0, 64], sizes = [2, 8, 8], strides = [1, 1, 1]} : vector<2x8x96xbf16> to vector<2x8x8xbf16>
    "tpu.trace_start"() <{level = 10 : i32, message = "bnd,bmd->bnm"}> : () -> ()
    %cst_3 = arith.constant dense<0.000000e+00> : vector<2x8x8xf32>
    %8 = tpu.matmul %5, %6, %cst_3 {dimension_numbers = #tpu.dot_dimension_numbers<[2], [2], [1], [1], [0, 0, 0, 1, 1, 1], [0], [0]>} : vector<2x8x8xbf16>, vector<2x8x8xbf16>, vector<2x8x8xf32> -> vector<2x8x8xf32>
    "tpu.trace_stop"() : () -> ()
    %cst_4 = arith.constant dense<0xFF800000> : vector<2x8xf32>
    %9 = vector.multi_reduction <maximumf>, %8, %cst_4 [2] : vector<2x8x8xf32> to vector<2x8xf32>
    %10 = vector.shape_cast %9 : vector<2x8xf32> to vector<2x8x1xf32>
    %11 = vector.broadcast %10 : vector<2x8x1xf32> to vector<2x8x8xf32>
    %12 = arith.subf %8, %11 : vector<2x8x8xf32>
    %13 = math.exp %12 : vector<2x8x8xf32>
    %cst_5 = arith.constant dense<0.000000e+00> : vector<2x8xf32>
    %14 = vector.multi_reduction <add>, %13, %cst_5 [2] : vector<2x8x8xf32> to vector<2x8xf32>
    %15 = vector.shape_cast %14 : vector<2x8xf32> to vector<2x8x1xf32>
    %16 = tpu.reciprocal %15 {approx = true} : vector<2x8x1xf32> -> vector<2x8x1xf32>
    %17 = vector.broadcast %16 : vector<2x8x1xf32> to vector<2x8x8xf32>
    %18 = arith.mulf %13, %17 : vector<2x8x8xf32>
    %19 = arith.truncf %18 : vector<2x8x8xf32> to vector<2x8x8xbf16>
    "tpu.trace_start"() <{level = 10 : i32, message = "bnm,bmd->bnd"}> : () -> ()
    %cst_6 = arith.constant dense<0.000000e+00> : vector<2x8x8xf32>
    %20 = tpu.matmul %19, %7, %cst_6 {dimension_numbers = #tpu.dot_dimension_numbers<[2], [1], [1], [2], [0, 0, 0, 1, 1, 2], [0], [0]>} : vector<2x8x8xbf16>, vector<2x8x8xbf16>, vector<2x8x8xf32> -> vector<2x8x8xf32>
    "tpu.trace_stop"() : () -> ()
    %21 = vector.shape_cast %20 : vector<2x8x8xf32> to vector<16x8xf32>
    %22 = arith.truncf %21 : vector<16x8xf32> to vector<16x8xbf16>
    %c0_7 = arith.constant 0 : index
    %c0_8 = arith.constant 0 : index
    %23 = vector.load %arg6[%c0_7, %c0_8] : memref<16x32xbf16, #tpu.memory_space<vmem>>, vector<16x8xbf16>
    tpu.vector_store %arg6[%c0_7, %c0_8], %22 {strides = array<i32>} : memref<16x32xbf16, #tpu.memory_space<vmem>>, vector<16x8xbf16>,
    %24 = vector.extract_strided_slice %4 {offsets = [0, 0, 8], sizes = [2, 8, 8], strides = [1, 1, 1]} : vector<2x8x96xbf16> to vector<2x8x8xbf16>
    %25 = vector.extract_strided_slice %4 {offsets = [0, 0, 40], sizes = [2, 8, 8], strides = [1, 1, 1]} : vector<2x8x96xbf16> to vector<2x8x8xbf16>
    %26 = vector.extract_strided_slice %4 {offsets = [0, 0, 72], sizes = [2, 8, 8], strides = [1, 1, 1]} : vector<2x8x96xbf16> to vector<2x8x8xbf16>
    "tpu.trace_start"() <{level = 10 : i32, message = "bnd,bmd->bnm"}> : () -> ()
    %cst_9 = arith.constant dense<0.000000e+00> : vector<2x8x8xf32>
    %27 = tpu.matmul %24, %25, %cst_9 {dimension_numbers = #tpu.dot_dimension_numbers<[2], [2], [1], [1], [0, 0, 0, 1, 1, 1], [0], [0]>} : vector<2x8x8xbf16>, vector<2x8x8xbf16>, vector<2x8x8xf32> -> vector<2x8x8xf32>
    "tpu.trace_stop"() : () -> ()
    %cst_10 = arith.constant dense<0xFF800000> : vector<2x8xf32>
    %28 = vector.multi_reduction <maximumf>, %27, %cst_10 [2] : vector<2x8x8xf32> to vector<2x8xf32>
    %29 = vector.shape_cast %28 : vector<2x8xf32> to vector<2x8x1xf32>
    %30 = vector.broadcast %29 : vector<2x8x1xf32> to vector<2x8x8xf32>
    %31 = arith.subf %27, %30 : vector<2x8x8xf32>
    %32 = math.exp %31 : vector<2x8x8xf32>
    %cst_11 = arith.constant dense<0.000000e+00> : vector<2x8xf32>
    %33 = vector.multi_reduction <add>, %32, %cst_11 [2] : vector<2x8x8xf32> to vector<2x8xf32>
    %34 = vector.shape_cast %33 : vector<2x8xf32> to vector<2x8x1xf32>
    %35 = tpu.reciprocal %34 {approx = true} : vector<2x8x1xf32> -> vector<2x8x1xf32>
    %36 = vector.broadcast %35 : vector<2x8x1xf32> to vector<2x8x8xf32>
    %37 = arith.mulf %32, %36 : vector<2x8x8xf32>
    %38 = arith.truncf %37 : vector<2x8x8xf32> to vector<2x8x8xbf16>
    "tpu.trace_start"() <{level = 10 : i32, message = "bnm,bmd->bnd"}> : () -> ()
    %cst_12 = arith.constant dense<0.000000e+00> : vector<2x8x8xf32>
    %39 = tpu.matmul %38, %26, %cst_12 {dimension_numbers = #tpu.dot_dimension_numbers<[2], [1], [1], [2], [0, 0, 0, 1, 1, 2], [0], [0]>} : vector<2x8x8xbf16>, vector<2x8x8xbf16>, vector<2x8x8xf32> -> vector<2x8x8xf32>
    "tpu.trace_stop"() : () -> ()
    %40 = vector.shape_cast %39 : vector<2x8x8xf32> to vector<16x8xf32>
    %41 = arith.truncf %40 : vector<16x8xf32> to vector<16x8xbf16>
    %c0_13 = arith.constant 0 : index
    %c8 = arith.constant 8 : index
    %42 = vector.load %arg6[%c0_13, %c8] : memref<16x32xbf16, #tpu.memory_space<vmem>>, vector<16x8xbf16>
    tpu.vector_store %arg6[%c0_13, %c8], %41 {strides = array<i32>} : memref<16x32xbf16, #tpu.memory_space<vmem>>, vector<16x8xbf16>,
    %43 = vector.extract_strided_slice %4 {offsets = [0, 0, 16], sizes = [2, 8, 8], strides = [1, 1, 1]} : vector<2x8x96xbf16> to vector<2x8x8xbf16>
    %44 = vector.extract_strided_slice %4 {offsets = [0, 0, 48], sizes = [2, 8, 8], strides = [1, 1, 1]} : vector<2x8x96xbf16> to vector<2x8x8xbf16>
    %45 = vector.extract_strided_slice %4 {offsets = [0, 0, 80], sizes = [2, 8, 8], strides = [1, 1, 1]} : vector<2x8x96xbf16> to vector<2x8x8xbf16>
    "tpu.trace_start"() <{level = 10 : i32, message = "bnd,bmd->bnm"}> : () -> ()
    %cst_14 = arith.constant dense<0.000000e+00> : vector<2x8x8xf32>
    %46 = tpu.matmul %43, %44, %cst_14 {dimension_numbers = #tpu.dot_dimension_numbers<[2], [2], [1], [1], [0, 0, 0, 1, 1, 1], [0], [0]>} : vector<2x8x8xbf16>, vector<2x8x8xbf16>, vector<2x8x8xf32> -> vector<2x8x8xf32>
    "tpu.trace_stop"() : () -> ()
    %cst_15 = arith.constant dense<0xFF800000> : vector<2x8xf32>
    %47 = vector.multi_reduction <maximumf>, %46, %cst_15 [2] : vector<2x8x8xf32> to vector<2x8xf32>
    %48 = vector.shape_cast %47 : vector<2x8xf32> to vector<2x8x1xf32>
    %49 = vector.broadcast %48 : vector<2x8x1xf32> to vector<2x8x8xf32>
    %50 = arith.subf %46, %49 : vector<2x8x8xf32>
    %51 = math.exp %50 : vector<2x8x8xf32>
    %cst_16 = arith.constant dense<0.000000e+00> : vector<2x8xf32>
    %52 = vector.multi_reduction <add>, %51, %cst_16 [2] : vector<2x8x8xf32> to vector<2x8xf32>
    %53 = vector.shape_cast %52 : vector<2x8xf32> to vector<2x8x1xf32>
    %54 = tpu.reciprocal %53 {approx = true} : vector<2x8x1xf32> -> vector<2x8x1xf32>
    %55 = vector.broadcast %54 : vector<2x8x1xf32> to vector<2x8x8xf32>
    %56 = arith.mulf %51, %55 : vector<2x8x8xf32>
    %57 = arith.truncf %56 : vector<2x8x8xf32> to vector<2x8x8xbf16>
    "tpu.trace_start"() <{level = 10 : i32, message = "bnm,bmd->bnd"}> : () -> ()
    %cst_17 = arith.constant dense<0.000000e+00> : vector<2x8x8xf32>
    %58 = tpu.matmul %57, %45, %cst_17 {dimension_numbers = #tpu.dot_dimension_numbers<[2], [1], [1], [2], [0, 0, 0, 1, 1, 2], [0], [0]>} : vector<2x8x8xbf16>, vector<2x8x8xbf16>, vector<2x8x8xf32> -> vector<2x8x8xf32>
    "tpu.trace_stop"() : () -> ()
    %59 = vector.shape_cast %58 : vector<2x8x8xf32> to vector<16x8xf32>
    %60 = arith.truncf %59 : vector<16x8xf32> to vector<16x8xbf16>
    %c0_18 = arith.constant 0 : index
    %c16 = arith.constant 16 : index
    %61 = vector.load %arg6[%c0_18, %c16] : memref<16x32xbf16, #tpu.memory_space<vmem>>, vector<16x8xbf16>
    tpu.vector_store %arg6[%c0_18, %c16], %60 {strides = array<i32>} : memref<16x32xbf16, #tpu.memory_space<vmem>>, vector<16x8xbf16>,
    %62 = vector.extract_strided_slice %4 {offsets = [0, 0, 24], sizes = [2, 8, 8], strides = [1, 1, 1]} : vector<2x8x96xbf16> to vector<2x8x8xbf16>
    %63 = vector.extract_strided_slice %4 {offsets = [0, 0, 56], sizes = [2, 8, 8], strides = [1, 1, 1]} : vector<2x8x96xbf16> to vector<2x8x8xbf16>
    %64 = vector.extract_strided_slice %4 {offsets = [0, 0, 88], sizes = [2, 8, 8], strides = [1, 1, 1]} : vector<2x8x96xbf16> to vector<2x8x8xbf16>
    "tpu.trace_start"() <{level = 10 : i32, message = "bnd,bmd->bnm"}> : () -> ()
    %cst_19 = arith.constant dense<0.000000e+00> : vector<2x8x8xf32>
    %65 = tpu.matmul %62, %63, %cst_19 {dimension_numbers = #tpu.dot_dimension_numbers<[2], [2], [1], [1], [0, 0, 0, 1, 1, 1], [0], [0]>} : vector<2x8x8xbf16>, vector<2x8x8xbf16>, vector<2x8x8xf32> -> vector<2x8x8xf32>
    "tpu.trace_stop"() : () -> ()
    %cst_20 = arith.constant dense<0xFF800000> : vector<2x8xf32>
    %66 = vector.multi_reduction <maximumf>, %65, %cst_20 [2] : vector<2x8x8xf32> to vector<2x8xf32>
    %67 = vector.shape_cast %66 : vector<2x8xf32> to vector<2x8x1xf32>
    %68 = vector.broadcast %67 : vector<2x8x1xf32> to vector<2x8x8xf32>
    %69 = arith.subf %65, %68 : vector<2x8x8xf32>
    %70 = math.exp %69 : vector<2x8x8xf32>
    %cst_21 = arith.constant dense<0.000000e+00> : vector<2x8xf32>
    %71 = vector.multi_reduction <add>, %70, %cst_21 [2] : vector<2x8x8xf32> to vector<2x8xf32>
    %72 = vector.shape_cast %71 : vector<2x8xf32> to vector<2x8x1xf32>
    %73 = tpu.reciprocal %72 {approx = true} : vector<2x8x1xf32> -> vector<2x8x1xf32>
    %74 = vector.broadcast %73 : vector<2x8x1xf32> to vector<2x8x8xf32>
    %75 = arith.mulf %70, %74 : vector<2x8x8xf32>
    %76 = arith.truncf %75 : vector<2x8x8xf32> to vector<2x8x8xbf16>
    "tpu.trace_start"() <{level = 10 : i32, message = "bnm,bmd->bnd"}> : () -> ()
    %cst_22 = arith.constant dense<0.000000e+00> : vector<2x8x8xf32>
    %77 = tpu.matmul %76, %64, %cst_22 {dimension_numbers = #tpu.dot_dimension_numbers<[2], [1], [1], [2], [0, 0, 0, 1, 1, 2], [0], [0]>} : vector<2x8x8xbf16>, vector<2x8x8xbf16>, vector<2x8x8xf32> -> vector<2x8x8xf32>
    "tpu.trace_stop"() : () -> ()
    %78 = vector.shape_cast %77 : vector<2x8x8xf32> to vector<16x8xf32>
    %79 = arith.truncf %78 : vector<16x8xf32> to vector<16x8xbf16>
    %c0_23 = arith.constant 0 : index
    %c24 = arith.constant 24 : index
    %80 = vector.load %arg6[%c0_23, %c24] : memref<16x32xbf16, #tpu.memory_space<vmem>>, vector<16x8xbf16>
    tpu.vector_store %arg6[%c0_23, %c24], %79 {strides = array<i32>} : memref<16x32xbf16, #tpu.memory_space<vmem>>, vector<16x8xbf16>,
    %c0_24 = arith.constant 0 : index
    %c0_25 = arith.constant 0 : index
    %81 = vector.load %arg6[%c0_24, %c0_25] : memref<16x32xbf16, #tpu.memory_space<vmem>>, vector<16x32xbf16>
    %c0_26 = arith.constant 0 : index
    %c0_27 = arith.constant 0 : index
    %82 = vector.load %arg3[%c0_26, %c0_27] : memref<32x32xbf16, #tpu.memory_space<vmem>>, vector<32x32xbf16>
    %cst_28 = arith.constant dense<0.000000e+00> : vector<16x32xf32>
    %83 = tpu.matmul %81, %82, %cst_28 {dimension_numbers = #tpu.dot_dimension_numbers<[1], [0], [0], [1], [0, 0, 1, 1], [], []>} : vector<16x32xbf16>, vector<32x32xbf16>, vector<16x32xf32> -> vector<16x32xf32>
    %c0_29 = arith.constant 0 : index
    %c0_30 = arith.constant 0 : index
    %84 = vector.load %arg4[%c0_29, %c0_30] : memref<1x32xf32, #tpu.memory_space<vmem>>, vector<1x32xf32>
    %85 = vector.broadcast %84 : vector<1x32xf32> to vector<16x32xf32>
    %86 = arith.addf %83, %85 : vector<16x32xf32>
    %c0_31 = arith.constant 0 : index
    %c0_32 = arith.constant 0 : index
    %87 = vector.load %arg5[%c0_31, %c0_32] : memref<16x32xf32, #tpu.memory_space<vmem>>, vector<16x32xf32>
    tpu.vector_store %arg5[%c0_31, %c0_32], %86 {strides = array<i32>} : memref<16x32xf32, #tpu.memory_space<vmem>>, vector<16x32xf32>,
    return
  }
  func.func @transform_0(%arg0: i32) -> (i32, i32) {
    %c0_i32 = arith.constant 0 : i32
    %c0_i32_0 = arith.constant 0 : i32
    return %arg0, %c0_i32 : i32, i32
  }
  func.func @transform_1(%arg0: i32) -> (i32, i32) {
    %c0_i32 = arith.constant 0 : i32
    %c0_i32_0 = arith.constant 0 : i32
    %c0_i32_1 = arith.constant 0 : i32
    return %c0_i32, %c0_i32_0 : i32, i32
  }
  func.func @transform_2(%arg0: i32) -> (i32, i32) {
    %c0_i32 = arith.constant 0 : i32
    %c0_i32_0 = arith.constant 0 : i32
    %c0_i32_1 = arith.constant 0 : i32
    return %c0_i32, %c0_i32_0 : i32, i32
  }
  func.func @transform_3(%arg0: i32) -> (i32, i32) {
    %c0_i32 = arith.constant 0 : i32
    %c0_i32_0 = arith.constant 0 : i32
    %c0_i32_1 = arith.constant 0 : i32
    return %c0_i32, %c0_i32_0 : i32, i32
  }
  func.func @transform_4(%arg0: i32) -> (i32, i32) {
    %c0_i32 = arith.constant 0 : i32
    %c0_i32_0 = arith.constant 0 : i32
    return %arg0, %c0_i32 : i32, i32
  }
}

</mosaic_0001>

<bundles_post_ra>
// kernel: tpu_custom_call.1
= control target key start
LH: loop header
LB: loop body
LE: loop exit
PB: predicated region body
PF: predicated region fallthrough
CT: control target
= control target key end

     0   :  { %9 = vsyncpa [#allocation4], 0  ;;  %s1605_s0 = inlined_call_operand.hbm [shape: bf16[32,32], index: 0, kind: input, shape index: {}]   ;;  %s1606_s1 = inlined_call_operand.hbm [shape: bf16[32,96], index: 1, kind: input, shape index: {}]   ;;  %s1607_s2 = inlined_call_operand.hbm [shape: bf16[32,32], index: 2, kind: input, shape index: {}]   ;;  %s1608_s3 = inlined_call_operand.vmem [shape: f32[1,32], index: 3, kind: input, shape index: {}]   ;;  %s1609_s4 = inlined_call_operand.hbm [shape: f32[32,32], index: 4, kind: output, shape index: {}]  }
   0x1   :  { %11 = vsyncpa [#allocation4 + $0x1], 0 }
   0x2   :  { %12 = vsyncpa [#allocation7], 0 }
   0x3   :  { %13 = vsyncpa [#allocation5], 0 }
   0x4   :  { %15 = vsyncpa [#allocation5 + $0x1], 0  ;;  %s1338_s15 = smov 0   ;;  %s1340_s16 = smov 0  }
   0x5   :  { %s1342_s17 = smov 0   ;;  %s1344_s18 = smov 0  }
   0x6 LB: > { %s1359_s19 = sadd.s32 4294967295, %s1292_s18   ;;  %s947_s20 = sadd.s32 4294967294, %s1292_s18   ;;  %s1292_s18 = sphi %s1344_s18, %s1619_s18   ;;  %s1288_s17 = sphi %s1342_s17, %s1618_s17   ;;  %s1284_s16 = sphi %s1340_s16, %s1617_s16   ;;  %s1280_s15 = sphi %s1338_s15, %s1616_s15  }
   0x7   : > { %p41_p0 = scmp.ne.s32.totalorder %s1284_s16, %s1280_s15  ;;  %p42_p1 = scmp.eq.s32.totalorder %s1359_s19, 0 }
   0x8   : > { %p128_p2 = scmp.eq.s32.totalorder %s1359_s19, 1  ;;  %p134_p3 = scmp.eq.s32.totalorder %s947_s20, 1 }
   0x9   : > { %p1368_p4 = por %p42_p1, %p41_p0  ;;  %p948_p5 = scmp.ge.s32.totalorder %s1292_s18, 1 }
   0xa   : > { %p1373_p6 = por %p134_p3, %p41_p0  ;;  %p141_p7 = scmp.lt.s32.totalorder %s1292_s18, 3 }
   0xb   : > { %s152_s25 = sshll.u32 %s1606_s1, 4  ;;  %s1294_s27 = smov [#allocation6]   ;;  %s153_s25 = int_to_ptr.hbm [resolvable:$true] %s152_s25 }
   0xc   : > { %p1381_p8 = pnand %p948_p5, %p141_p7  ;;  %s154_s28 = sshll.u32 %s1294_s27, 4  ;;  %s155_s28 = int_to_ptr.vmem [resolvable:$true] %s154_s28 }
   0xd   : > { %s166_s5 = sshll.u32 %s1607_s2, 4  ;;  %s1295_s6 = smov 64   ;;  %s167_s5 = int_to_ptr.hbm [resolvable:$true] %s166_s5 }
   0xe   : > { %p1027_p9 = pneg %p1381_p8  ;;  %s1296_s7 = smov 4  }
   0xf   : > { %s1297_s8 = smov [#allocation8]   ;;  %s1400_s10 = sadd.s32 1, %s1292_s18  }
  0x10   : > { %p1028_p10 = pnand %p1027_p9, %p42_p1  ;;  %s168_s9 = sshll.u32 %s1297_s8, 4  ;;  %s169_s9 = int_to_ptr.vmem [resolvable:$true] %s168_s9 }
  0x11   : > { %s28_s11 = sadd.s32 1, %s1288_s17  ;;  %s25_s12 = ssub.s32 %s1292_s18, %s1400_s10 }
  0x12   : > { %1030 = dma.hbm_to_vmem [thread:$0]  (!%p1028_p10), %s153_s25, 256, %s155_s28, [#allocation7], %s1295_s6, %s1295_s6, %s1296_s7  }
  0x13   : > { %1033 = dma.hbm_to_vmem [thread:$0]  (!%p1028_p10), %s167_s5, 256, %s169_s9, [#allocation7], %s1295_s6, %s1295_s6, %s1296_s7  }
  0x14   : > { %p35_p12 = scmp.ne.s32.totalorder %s1288_s17, %s1284_s16  ;;  %p26_p13 = scmp.eq.s32.totalorder %s25_s12, 0 }
  0x15   : > { %p36_p0 = scmp.eq.s32.totalorder %s1292_s18, 0  ;;  %p1044_p5 = scmp.lt.s32.totalorder %s1292_s18, 2 }
  0x16   : > { %p1410_p3 = por %p128_p2, %p35_p12  ;;  %s185_s20 = sand.u32 1, %s1288_s17  }
  0x17   : > { %s1416_s14 = scalar_select %p26_p13, %s1288_s17, %s28_s11  }
  0x18   : > { %p37_p7 = por %p36_p0, %p35_p12  ;;  %s952_s23 = sshll.u32 %s185_s20, 3 }
  0x19   : > { %s1007_s24 = sshll.u32 %s1292_s18, 3  ;;  %s189_s29 = scalar_lea.vmem [#allocation3], %s952_s23 }
  0x1a   : > { %s194_s28 = scalar_lea.hbm %s1605_s0, %s1007_s24  ;;  %s197_s30 = sshll.u32 %s189_s29, 4  ;;  %s198_s30 = int_to_ptr.vmem [resolvable:$true] %s197_s30 }
  0x1b   : > { %s195_s5 = sshll.u32 %s194_s28, 4  ;;  %p1423_p2 = pnand %p1044_p5, %p37_p7  ;;  %s196_s5 = int_to_ptr.hbm [resolvable:$true] %s195_s5 }
  0x1c   : > { %s186_s9 = scalar_lea.sflag [#allocation4], %s185_s20  ;;  %s1192_s11 = sshra.s32 %s196_s5, 4  ;;  %s1193_s11 = int_to_ptr.hbm [resolvable:$true] %s1192_s11 }
  0x1d   : > { %s1194_s12 = scalar_lea.hbm %s1193_s11, 8  ;;  %p1196_p10 = pneg %p1423_p2 }
  0x1e   : > { %p1195_p9 = scmp.ne.s32.totalorder %s1193_s11, %s1194_s12  ;;  %s1199_s25 = scalar_lea.hbm %s1605_s0, 16 }
  0x1f   : > { %p1200_p0 = scmp.lt.s32.totalorder %s1193_s11, %s1605_s0  ;;  %p1201_p5 = scmp.lt.s32.totalorder %s1199_s25, %s1194_s12 }
  0x20   : > { %p1197_p12 = pnand %p1196_p10, %p1195_p9 }
  0x21   : > { %p1202_p7 = por %p1201_p5, %p1200_p0 }
  0x22   : > { %p1198_p13 = pneg %p1197_p12 }
  0x24   : > { %p1203_p11 = pnand %p1202_p7, %p1198_p13 }
  0x26   : > { %1206 = shalt.err (!%p1203_p11)
}
  0x27   : > { %1037 = dma.hbm_to_vmem [thread:$0]  (!%p1423_p2), %s196_s5, 128, %s198_s30, %s186_s9, %s1295_s6, %s1295_s6, %s1296_s7  }
  0x28   : > { %209 = sbr.rel (%p1381_p8) target bundleno = 1189 (0x4a5), region = 36  ;;  %s1443_s20 = sand.u32 (!%p1381_p8), 1, %s1284_s16  }
  0x29   : > { %s956_s29 = sshll.u32 (!%p1381_p8), %s1443_s20, 3  ;;  %s212_s11 = scalar_lea.sflag (!%p1381_p8), [#allocation4], %s1443_s20 }
  0x2a   : > { %s215_s12 = scalar_lea.vmem (!%p1381_p8), [#allocation3], %s956_s29 }
  0x2d   : > { %1267 = dma.done.wait (%p1368_p4), %s212_s11, 128  }
  0x2e   : > { %1269 = vsyncadd (%p1368_p4), %s212_s11, 4294967168 }
  0x2f   : > { %1271 = dma.done.wait (%p42_p1), [#allocation7], 512  }
  0x30   : > { %1273 = vsyncadd (%p42_p1), [#allocation7], 4294966784  ;;  %v1010_v0 = vld [vmem:[#allocation6 + $0x8] sm:$0xff]  ;;  %v1009_v1 = vld [vmem:[#allocation6] sm:$0xff]  ;;  %vm277_vm0 = vcmask 261120   ;;  %s1298_s21 = smov 120  }
  0x31   : > { %287 = vmatpush.bf16.msra.mxu0 %v1010_v0  ;;  %v1008_v2 = vld [vmem:[%s215_s12] sm:$0xff]  ;;  %s1299_s26 = smov 88   ;;  %s1300_s6 = smov 96   ;;  %vm302_vm1 = vcmask 64512   ;;  %vm375_vm2 = vcmask 1043456   ;;  %vm415_vm3 = vcmask 60416  }
  0x32   : > { %s1301_s7 = smov 112   ;;  %s1302_s30 = smov 80   ;;  %vm540_vm4 = vcmask 126016   ;;  %vm665_vm5 = vcmask 191616   ;;  %vm790_vm6 = vcmask 257216  }
  0x33   : > { %s1303_s5 = smov 72   ;;  %s1304_s8 = smov 104  }
  0x34   : > { %s1305_s9 = smov 64   ;;  %s1306_s24 = smov 56  }
  0x35   : > { %288 = vmatpush.bf16.msra.mxu0 %v1009_v1  ;;  %s1307_s23 = smov 48   ;;  %s1308_s25 = smov 40  }
  0x36   : > { %s1309_s27 = smov 8   ;;  %s1310_s28 = smov 16  }
  0x37   : > { %s1311_s29 = smov 24   ;;  %s959_s11 = sshll.u32 %s1443_s20, 4 }
  0x38   : > { %972 = vmatmul.msk.bf16.vlgmr.msra.gmra.mxu0 %vm277_vm0, %v1008_v2 }
  0xb5   : > { %v290_v3 = vpop.f32.mrf.mxu0 }
  0xb6   : > { %v295_v4 = vpack.c.bf16 %v290_v3, %v290_v3 }
  0xb8   : > { %v298_v5 = vunpack.c.l.b16 %v295_v4 }
  0xba   : > { %v1456_v6 = vpack.c.b16 %v298_v5, %v298_v5 }
  0xbc   : > { %418 = vrot.lane.b32.xlu2 %v1456_v6, %s1298_s21  ;;  %420 = vrot.lane.b32.xlu1 %v1456_v6, %s1299_s26 }
  0xbd   : > { %300 = vrot.lane.b32.xlu0 %v1456_v6, %s1300_s6  ;;  %v292_v7 = vpop.f32.mrf.mxu0 }
  0xbe   : > { %v296_v8 = vpack.c.bf16 %v292_v7, %v292_v7 }
  0xc0   : > { %v323_v9 = vunpack.c.l.b16 %v296_v8 }
  0xc2   : > { %v1461_v10 = vpack.c.b16 %v323_v9, %v323_v9 }
  0xc4   : > { %441 = vrot.lane.b32.xlu2 %v1461_v10, %s1298_s21  ;;  %443 = vrot.lane.b32.xlu1 %v1461_v10, %s1299_s26  ;;  %s1014_s26 = sshll.u32 %s1359_s19, 4 }
  0xc5   : > { %325 = vrot.lane.b32.xlu0 %v1461_v10, %s1300_s6  ;;  %s250_s6 = scalar_lea.vmem [#allocation9], %s959_s11 }
  0xcc   : > { %543 = vrot.lane.b32.xlu2 %v1456_v6, %s1301_s7  ;;  %568 = vrot.lane.b32.xlu1 %v1461_v10, %s1302_s30 }
  0xcd   : > { %545 = vrot.lane.b32.xlu0 %v1456_v6, %s1302_s30 }
  0xd4   : > { %693 = vrot.lane.b32.xlu2 %v1461_v10, %s1303_s5  ;;  %670 = vrot.lane.b32.xlu1 %v1456_v6, %s1303_s5  ;;  %s851_s5 = scalar_lea.hbm %s1609_s4, %s1014_s26 }
  0xd5   : > { %566 = vrot.lane.b32.xlu0 %v1461_v10, %s1301_s7 }
  0xdc   : > { %691 = vrot.lane.b32.xlu1 %v1461_v10, %s1304_s8 }
  0xdd   : > { %668 = vrot.lane.b32.xlu0 %v1456_v6, %s1304_s8  ;;  %s852_s8 = sshll.u32 %s250_s6, 4  ;;  %s853_s8 = int_to_ptr.vmem [resolvable:$true] %s852_s8 }
 0x116   : > { %v419_v11 = vpop.permute.xlu2 %418 }
 0x11e   : > { %v442_v16 = vpop.permute.xlu2 %441 }
 0x126   : > { %v544_v21 = vpop.permute.xlu2 %543 }
 0x12e   : > { %v421_v12 = vpop.permute.xlu1 %420  ;;  %v694_v26 = vpop.permute.xlu2 %693 }
 0x12f   : > { %v301_v13 = vpop.permute.xlu0 %300  ;;  %v426_v14 = vsel %vm302_vm1, %v421_v12, 0  ;;  %v699_v29 = vsel %vm302_vm1, %v694_v26, 0 }
 0x130   : > { %v307_v15 = vsel %vm302_vm1, %v301_v13, 0  ;;  %435 = vmatpush.bf16.xpose.msrb.mxu0 %v426_v14 }
 0x131   : > { %316 = vmatpush.bf16.xpose.msra.mxu1 %v307_v15 }
 0x136   : > { %v444_v17 = vpop.permute.xlu1 %443 }
 0x137   : > { %v326_v18 = vpop.permute.xlu0 %325  ;;  %977 = vmatmul.msk.bf16.vlgmr.msrb.gmra.mxu0 %vm302_vm1, %v419_v11  ;;  %v449_v19 = vsel %vm302_vm1, %v444_v17, 0 }
 0x138   : > { %973 = vmatmul.msk.bf16.vlgmr.msra.gmra.mxu1 %vm302_vm1, %v295_v4  ;;  %v331_v20 = vsel %vm302_vm1, %v326_v18, 0 }
 0x139   : > { %340 = vmatpush.bf16.xpose.msra.mxu2 %v331_v20  ;;  %458 = vmatpush.bf16.xpose.msrb.mxu1 %v449_v19 }
 0x13e   : > { %v569_v22 = vpop.permute.xlu1 %568 }
 0x13f   : > { %v574_v23 = vsel %vm302_vm1, %v569_v22, 0  ;;  %v546_v24 = vpop.permute.xlu0 %545 }
 0x140   : > { %v551_v25 = vsel %vm302_vm1, %v546_v24, 0  ;;  %974 = vmatmul.msk.bf16.vlgmr.msra.gmra.mxu2 %vm302_vm1, %v296_v8 }
 0x141   : > { %583 = vmatpush.bf16.xpose.msra.mxu1 %v574_v23  ;;  %560 = vmatpush.bf16.xpose.msra.mxu0 %v551_v25 }
 0x146   : > { %v671_v27 = vpop.permute.xlu1 %670 }
 0x147   : > { %v676_v28 = vsel %vm302_vm1, %v671_v27, 0  ;;  %v567_v30 = vpop.permute.xlu0 %566 }
 0x148   : > { %978 = vmatmul.msk.bf16.vlgmr.msrb.gmra.mxu1 %vm302_vm1, %v442_v16  ;;  %981 = vmatmul.msk.bf16.vlgmr.msra.gmra.mxu0 %vm302_vm1, %v544_v21 }
 0x149   : > { %708 = vmatpush.bf16.xpose.msrb.mxu1 %v699_v29  ;;  %685 = vmatpush.bf16.xpose.msrb.mxu0 %v676_v28 }
 0x14e   : > { %v692_v32 = vpop.permute.xlu1 %691 }
 0x14f   : > { %v669_v31 = vpop.permute.xlu0 %668 }
 0x158   : > { %982 = vmatmul.msk.bf16.vlgmr.msra.gmra.mxu1 %vm302_vm1, %v567_v30  ;;  %985 = vmatmul.msk.bf16.vlgmr.msrb.gmra.mxu0 %vm302_vm1, %v669_v31 }
 0x168   : > { %986 = vmatmul.msk.bf16.vlgmr.msrb.gmra.mxu1 %vm302_vm1, %v692_v32 }
 0x1b4   : > { %v437_v33 = vpop.f32.mrf.mxu0 }
 0x1b5   : > { %v318_v34 = vpop.f32.mrf.mxu1  ;;  %v464_v35 = vsel %vm302_vm1, %v437_v33, -inf }
 0x1b6   : > { %v346_v36 = vsel %vm302_vm1, %v318_v34, -inf  ;;  %465 = vmax.xlane.f32.xlu1 %v464_v35 }
 0x1b7   : > { %347 = vmax.xlane.f32.xlu2 %v346_v36 }
 0x1bc   : > { %v439_v37 = vpop.f32.mrf.mxu0 }
 0x1bd   : > { %v320_v38 = vpop.f32.mrf.mxu1 }
 0x1c3   : > { %v342_v39 = vpop.f32.mrf.mxu2 }
 0x1c4   : > { %v349_v40 = vsel %vm302_vm1, %v342_v39, -inf }
 0x1c5   : > { %v460_v41 = vpop.f32.mrf.mxu1  ;;  %350 = vmax.xlane.f32.xlu0 %v349_v40  ;;  %v1493_v42 = vpop.f32.mrf.mxu0 }
 0x1c6   : > { %v467_v43 = vsel %vm302_vm1, %v460_v41, -inf  ;;  %v589_v55 = vsel %vm302_vm1, %v1493_v42, -inf }
 0x1c7   : > { %468 = vmax.xlane.f32.xlu2 %v467_v43 }
 0x1cb   : > { %v344_v44 = vpop.f32.mrf.mxu2 }
 0x1cd   : > { %v462_v45 = vpop.f32.mrf.mxu1  ;;  %v564_v46 = vpop.f32.mrf.mxu0 }
 0x1cf   : > { %392 = vrot.lane.b32.xlu1 %v1461_v10, %s1305_s9 }
 0x1d5   : > { %v1497_v47 = vpop.f32.mrf.mxu1  ;;  %v1499_v48 = vpop.f32.mrf.mxu0 }
 0x1d6   : > { %v592_v54 = vsel %vm302_vm1, %v1497_v47, -inf  ;;  %v714_v56 = vsel %vm302_vm1, %v1499_v48, -inf }
 0x1d7   : > { %509 = vrot.lane.b32.xlu1 %v1461_v10, %s1306_s24 }
 0x1d9   : > { %488 = vrot.lane.b32.xlu0 %v1456_v6, %s1306_s24  ;;  %s840_s24 = scalar_lea.sflag [#allocation5], %s1443_s20 }
 0x1dd   : > { %v587_v49 = vpop.f32.mrf.mxu1  ;;  %v689_v50 = vpop.f32.mrf.mxu0 }
 0x1df   : > { %370 = vrot.lane.b32.xlu2 %v1456_v6, %s1305_s9  ;;  %s854_s9 = sshll.u32 %s851_s5, 4  ;;  %s855_s9 = int_to_ptr.hbm [resolvable:$true] %s854_s9 }
 0x1e5   : > { %v710_v51 = vpop.f32.mrf.mxu1 }
 0x1e6   : > { %v717_v53 = vsel %vm302_vm1, %v710_v51, -inf }
 0x1ed   : > { %v712_v52 = vpop.f32.mrf.mxu1 }
 0x201   : > { %718 = vmax.xlane.f32.xlu1 %v717_v53 }
 0x203   : > { %593 = vmax.xlane.f32.xlu0 %v592_v54 }
 0x208   : > { %590 = vmax.xlane.f32.xlu2 %v589_v55 }
 0x20b   : > { %715 = vmax.xlane.f32.xlu0 %v714_v56 }
 0x229   : > { %v466_v57 = vpop.xlane.xlu1 %465 }
 0x22a   : > { %v348_v58 = vpop.xlane.xlu2 %347  ;;  %v470_v59 = vsub.f32 %v437_v33, %v466_v57 }
 0x22b   : > { %v352_v60 = vsub.f32 %v318_v34, %v348_v58 }
 0x22c   : > { %v472_v61 = vmul.f32 1.442695, %v470_v59 }
 0x22d   : > { %v354_v62 = vmul.f32 1.442695, %v352_v60 }
 0x22e   : > { %1100 = vpow2.f32 %v472_v61 }
 0x22f   : > { %1102 = vpow2.f32 %v354_v62 }
 0x234   : > { %v1511_v63 = vpop.eup %1100 }
 0x235   : > { %v1513_v0 = vpop.eup %1102  ;;  %v476_v1 = vsel %vm302_vm1, %v1511_v63, 0.0 }
 0x236   : > { %v358_v2 = vsel %vm302_vm1, %v1513_v0, 0.0  ;;  %477 = vadd.xlane.f32.xlu0 %v476_v1 }
 0x237   : > { %359 = vadd.xlane.f32.xlu1 %v358_v2 }
 0x238   : > { %v351_v3 = vpop.xlane.xlu0 %350 }
 0x239   : > { %v353_v4 = vsub.f32 %v342_v39, %v351_v3 }
 0x23a   : > { %v469_v5 = vpop.xlane.xlu2 %468 }
 0x23b   : > { %v356_v7 = vmul.f32 1.442695, %v353_v4  ;;  %v471_v8 = vsub.f32 %v460_v41, %v469_v5 }
 0x23d   : > { %1104 = vpow2.f32 %v356_v7  ;;  %v474_v9 = vmul.f32 1.442695, %v471_v8 }
 0x23f   : > { %1106 = vpow2.f32 %v474_v9 }
 0x241   : > { %v393_v11 = vpop.permute.xlu1 %392 }
 0x242   : > { %v371_v12 = vpop.permute.xlu2 %370  ;;  %v398_v13 = vsel %vm375_vm2, %v393_v11, 0 }
 0x243   : > { %v1520_v14 = vpop.eup %1104  ;;  %v377_v15 = vsel %vm375_vm2, %v371_v12, 0 }
 0x244   : > { %386 = vmatpush.bf16.msra.mxu3 %v377_v15  ;;  %v361_v16 = vsel %vm302_vm1, %v1520_v14, 0.0 }
 0x245   : > { %v1525_v17 = vpop.eup %1106  ;;  %362 = vadd.xlane.f32.xlu0 %v361_v16 }
 0x246   : > { %v479_v18 = vsel %vm302_vm1, %v1525_v17, 0.0 }
 0x247   : > { %480 = vadd.xlane.f32.xlu2 %v479_v18 }
 0x248   : > { %407 = vmatpush.bf16.msrb.mxu3 %v398_v13 }
 0x249   : > { %v510_v21 = vpop.permute.xlu1 %509 }
 0x24a   : > { %v515_v50 = vsel %vm375_vm2, %v510_v21, 0 }
 0x24b   : > { %v489_v19 = vpop.permute.xlu0 %488 }
 0x24c   : > { %v494_v20 = vsel %vm375_vm2, %v489_v19, 0 }
 0x24d   : > { %503 = vmatpush.bf16.msrb.mxu2 %v494_v20 }
 0x250   : > { %634 = vrot.lane.b32.xlu1 %v1461_v10, %s1307_s23 }
 0x25f   : > { %613 = vrot.lane.b32.xlu2 %v1456_v6, %s1307_s23  ;;  %s1236_s23 = sshra.s32 %s855_s9, 4  ;;  %s1237_s23 = int_to_ptr.hbm [resolvable:$true] %s1236_s23 }
 0x260   : > { %s1238_s19 = scalar_lea.hbm %s1237_s23, 16  ;;  %p1243_p11 = scmp.lt.s32.totalorder %s1237_s23, %s1609_s4 }
 0x261   : > { %p1239_p1 = scmp.ne.s32.totalorder %s1237_s23, %s1238_s19 }
 0x263   : > { %p1240_p4 = pnand %p1239_p1, %p1410_p3 }
 0x265   : > { %p1241_p8 = pneg %p1240_p4 }
 0x274   : > { %v719_v22 = vpop.xlane.xlu1 %718 }
 0x275   : > { %v721_v23 = vsub.f32 %v710_v51, %v719_v22 }
 0x276   : > { %v594_v24 = vpop.xlane.xlu0 %593 }
 0x277   : > { %v596_v25 = vsub.f32 %v1497_v47, %v594_v24  ;;  %v724_v27 = vmul.f32 1.442695, %v721_v23 }
 0x279   : > { %v599_v26 = vmul.f32 1.442695, %v596_v25 }
 0x27b   : > { %1108 = vpow2.f32 %v599_v26  ;;  %v591_v28 = vpop.xlane.xlu2 %590 }
 0x27c   : > { %v595_v29 = vsub.f32 %v1493_v42, %v591_v28  ;;  %1110 = vpow2.f32 %v724_v27 }
 0x27e   : > { %v597_v30 = vmul.f32 1.442695, %v595_v29  ;;  %v716_v31 = vpop.xlane.xlu0 %715 }
 0x27f   : > { %v720_v32 = vsub.f32 %v1499_v48, %v716_v31 }
 0x280   : > { %1112 = vpow2.f32 %v597_v30 }
 0x281   : > { %v1109_v33 = vpop.eup %1108  ;;  %v722_v34 = vmul.f32 1.442695, %v720_v32 }
 0x282   : > { %v604_v35 = vsel %vm302_vm1, %v1109_v33, 0.0  ;;  %v1536_v36 = vpop.eup %1110 }
 0x283   : > { %1114 = vpow2.f32 %v722_v34  ;;  %605 = vadd.xlane.f32.xlu0 %v604_v35  ;;  %v729_v39 = vsel %vm302_vm1, %v1536_v36, 0.0 }
 0x286   : > { %v1113_v37 = vpop.eup %1112 }
 0x287   : > { %v601_v38 = vsel %vm302_vm1, %v1113_v37, 0.0 }
 0x288   : > { %602 = vadd.xlane.f32.xlu1 %v601_v38  ;;  %730 = vadd.xlane.f32.xlu2 %v729_v39 }
 0x289   : > { %v1115_v40 = vpop.eup %1114 }
 0x28a   : > { %v726_v41 = vsel %vm302_vm1, %v1115_v40, 0.0 }
 0x28b   : > { %727 = vadd.xlane.f32.xlu0 %v726_v41 }
 0x29f   : > { %738 = vrot.lane.b32.xlu0 %v1456_v6, %s1308_s25 }
 0x2a1   : > { %759 = vrot.lane.b32.xlu1 %v1461_v10, %s1308_s25 }
 0x2a9   : > { %v478_v42 = vpop.xlane.xlu0 %477 }
 0x2aa   : > { %v360_v43 = vpop.xlane.xlu1 %359  ;;  %1116 = vrcp.f32 %v478_v42 }
 0x2ab   : > { %1118 = vrcp.f32 %v360_v43 }
 0x2b0   : > { %v1117_v44 = vpop.eup %1116 }
 0x2b1   : > { %v1119_v45 = vpop.eup %1118  ;;  %v484_v46 = vmul.f32 %v1117_v44, %v1511_v63 }
 0x2b2   : > { %v366_v47 = vmul.f32 %v1119_v45, %v1513_v0  ;;  %v1013_v45 = vld [vmem:[#allocation8 + $0x8] sm:$0xff] }
 0x2b3   : > { %v486_v48 = vpack.c.bf16 %v484_v46, %v484_v46  ;;  %829 = vmatpush.bf16.msra.mxu0 %v1013_v45  ;;  %v1012_v46 = vld [vmem:[#allocation8] sm:$0xff] }
 0x2b4   : > { %v368_v49 = vpack.c.bf16 %v366_v47, %v366_v47 }
 0x2b5   : > { %979 = vmatmul.msk.bf16.vlgmr.msrb.gmra.mxu2 %vm302_vm1, %v486_v48 }
 0x2b6   : > { %975 = vmatmul.msk.bf16.vlgmr.msra.gmra.mxu3 %vm302_vm1, %v368_v49 }
 0x2b7   : > { %524 = vmatpush.bf16.msra.mxu3 %v515_v50  ;;  %830 = vmatpush.bf16.msra.mxu0 %v1012_v46 }
 0x2b8   : > { %v363_v6 = vpop.xlane.xlu0 %362 }
 0x2b9   : > { %1120 = vrcp.f32 %v363_v6 }
 0x2ba   : > { %v481_v10 = vpop.xlane.xlu2 %480 }
 0x2bb   : > { %1122 = vrcp.f32 %v481_v10  ;;  %v1099_v10 = vld [vmem:[%s1608_s3] ss:$0 sm:$0xff] }
 0x2bf   : > { %v1121_v51 = vpop.eup %1120 }
 0x2c0   : > { %v367_v52 = vmul.f32 %v1121_v51, %v1520_v14 }
 0x2c1   : > { %v1123_v58 = vpop.eup %1122 }
 0x2c2   : > { %v614_v53 = vpop.permute.xlu2 %613  ;;  %v635_v55 = vpop.permute.xlu1 %634  ;;  %v369_v56 = vpack.c.bf16 %v367_v52, %v367_v52  ;;  %v485_v59 = vmul.f32 %v1123_v58, %v1525_v17 }
 0x2c3   : > { %v619_v54 = vsel %vm375_vm2, %v614_v53, 0  ;;  %v640_v57 = vsel %vm375_vm2, %v635_v55, 0 }
 0x2c4   : > { %628 = vmatpush.bf16.msra.mxu2 %v619_v54  ;;  %v487_v60 = vpack.c.bf16 %v485_v59, %v485_v59 }
 0x2c6   : > { %976 = vmatmul.msk.bf16.vlgmr.msrb.gmra.mxu3 %vm302_vm1, %v369_v56 }
 0x2c7   : > { %649 = vmatpush.bf16.msrb.mxu3 %v640_v57 }
 0x2d6   : > { %980 = vmatmul.msk.bf16.vlgmr.msra.gmra.mxu3 %vm302_vm1, %v487_v60 }
 0x2f6   : > { %v606_v61 = vpop.xlane.xlu0 %605 }
 0x2f7   : > { %1124 = vrcp.f32 %v606_v61 }
 0x2fb   : > { %v603_v62 = vpop.xlane.xlu1 %602  ;;  %v731_v4 = vpop.xlane.xlu2 %730 }
 0x2fc   : > { %1126 = vrcp.f32 %v603_v62 }
 0x2fd   : > { %v1125_v63 = vpop.eup %1124  ;;  %1128 = vrcp.f32 %v731_v4 }
 0x2fe   : > { %v610_v0 = vmul.f32 %v1125_v63, %v1109_v33  ;;  %v728_v7 = vpop.xlane.xlu0 %727 }
 0x2ff   : > { %1130 = vrcp.f32 %v728_v7 }
 0x300   : > { %v612_v1 = vpack.c.bf16 %v610_v0, %v610_v0 }
 0x302   : > { %984 = vmatmul.msk.bf16.vlgmr.msrb.gmra.mxu3 %vm302_vm1, %v612_v1  ;;  %v1127_v2 = vpop.eup %1126 }
 0x303   : > { %v609_v3 = vmul.f32 %v1127_v2, %v1113_v37  ;;  %v1129_v8 = vpop.eup %1128 }
 0x304   : > { %v735_v12 = vmul.f32 %v1129_v8, %v1536_v36 }
 0x305   : > { %v611_v5 = vpack.c.bf16 %v609_v3, %v609_v3  ;;  %v1131_v9 = vpop.eup %1130 }
 0x306   : > { %v734_v13 = vmul.f32 %v1131_v9, %v1115_v40  ;;  %v737_v17 = vpack.c.bf16 %v735_v12, %v735_v12 }
 0x307   : > { %983 = vmatmul.msk.bf16.vlgmr.msra.gmra.mxu2 %vm302_vm1, %v611_v5 }
 0x308   : > { %v736_v18 = vpack.c.bf16 %v734_v13, %v734_v13 }
 0x311   : > { %v739_v11 = vpop.permute.xlu0 %738 }
 0x312   : > { %v744_v14 = vsel %vm375_vm2, %v739_v11, 0 }
 0x313   : > { %v760_v15 = vpop.permute.xlu1 %759  ;;  %753 = vmatpush.bf16.msrb.mxu2 %v744_v14 }
 0x314   : > { %v765_v16 = vsel %vm375_vm2, %v760_v15, 0 }
 0x315   : > { %774 = vmatpush.bf16.msra.mxu3 %v765_v16 }
 0x317   : > { %987 = vmatmul.msk.bf16.vlgmr.msrb.gmra.mxu2 %vm302_vm1, %v736_v18 }
 0x318   : > { %988 = vmatmul.msk.bf16.vlgmr.msra.gmra.mxu3 %vm302_vm1, %v737_v17 }
 0x338   : > { %v505_v19 = vpop.f32.mrf.mxu2 }
 0x339   : > { %v388_v20 = vpop.f32.mrf.mxu3  ;;  %v530_v21 = vpack.c.bf16 %v505_v19, %v505_v19 }
 0x33a   : > { %v413_v22 = vpack.c.bf16 %v388_v20, %v388_v20 }
 0x33b   : > { %534 = vrot.lane.b32.xlu0 %v530_v21, %s1309_s27 }
 0x33c   : > { %416 = vst.msk [vmem:[#allocation2] sm:$0xf] %vm415_vm3, %v413_v22 }
 0x340   : > { %v507_v23 = vpop.f32.mrf.mxu2 }
 0x341   : > { %v390_v24 = vpop.f32.mrf.mxu3 }
 0x349   : > { %v409_v25 = vpop.f32.mrf.mxu3 }
 0x34a   : > { %v414_v26 = vpack.c.bf16 %v409_v25, %v409_v25 }
 0x34c   : > { %417 = vst.msk [vmem:[#allocation2 + $0x4] sm:$0xf] %vm415_vm3, %v414_v26 }
 0x351   : > { %v411_v27 = vpop.f32.mrf.mxu3 }
 0x359   : > { %v526_v28 = vpop.f32.mrf.mxu3 }
 0x35a   : > { %v531_v29 = vpack.c.bf16 %v526_v28, %v526_v28 }
 0x35c   : > { %536 = vrot.lane.b32.xlu1 %v531_v29, %s1309_s27 }
 0x361   : > { %v528_v30 = vpop.f32.mrf.mxu3 }
 0x385   : > { %v651_v31 = vpop.f32.mrf.mxu3 }
 0x386   : > { %v656_v32 = vpack.c.bf16 %v651_v31, %v651_v31 }
 0x388   : > { %661 = vrot.lane.b32.xlu1 %v656_v32, %s1310_s28 }
 0x38a   : > { %v630_v33 = vpop.f32.mrf.mxu2 }
 0x38b   : > { %v655_v34 = vpack.c.bf16 %v630_v33, %v630_v33 }
 0x38d   : > { %v653_v35 = vpop.f32.mrf.mxu3  ;;  %659 = vrot.lane.b32.xlu0 %v655_v34, %s1310_s28 }
 0x392   : > { %v632_v36 = vpop.f32.mrf.mxu2 }
 0x39a   : > { %v755_v37 = vpop.f32.mrf.mxu2 }
 0x39b   : > { %v776_v38 = vpop.f32.mrf.mxu3  ;;  %v780_v39 = vpack.c.bf16 %v755_v37, %v755_v37 }
 0x39c   : > { %v781_v40 = vpack.c.bf16 %v776_v38, %v776_v38 }
 0x39d   : > { %784 = vrot.lane.b32.xlu2 %v780_v39, %s1311_s29 }
 0x39e   : > { %786 = vrot.lane.b32.xlu0 %v781_v40, %s1311_s29  ;;  %s1242_s29 = scalar_lea.hbm %s1609_s4, 32 }
 0x39f   : > { %p1244_p2 = scmp.lt.s32.totalorder %s1242_s29, %s1238_s19 }
 0x3a1   : > { %p1245_p9 = por %p1244_p2, %p1243_p11 }
 0x3a2   : > { %v757_v41 = vpop.f32.mrf.mxu2 }
 0x3a3   : > { %v778_v42 = vpop.f32.mrf.mxu3  ;;  %p1246_p10 = pnand %p1245_p9, %p1241_p8 }
 0x3ad   : > { %v535_v43 = vpop.permute.xlu0 %534 }
 0x3ae   : > { %541 = vst.msk [vmem:[#allocation2] sm:$0xf] %vm540_vm4, %v535_v43 }
 0x3ce   : > { %v537_v44 = vpop.permute.xlu1 %536 }
 0x3cf   : > { %542 = vst.msk [vmem:[#allocation2 + $0x4] sm:$0xf] %vm540_vm4, %v537_v44 }
 0x3f7   : > { %v785_v49 = vpop.permute.xlu2 %784 }
 0x3fa   : > { %v662_v47 = vpop.permute.xlu1 %661 }
 0x3fb   : > { %667 = vst.msk [vmem:[#allocation2 + $0x4] sm:$0xf] %vm665_vm5, %v662_v47 }
 0x3ff   : > { %v660_v48 = vpop.permute.xlu0 %659 }
 0x400   : > { %666 = vst.msk [vmem:[#allocation2] sm:$0xf] %vm665_vm5, %v660_v48 }
 0x401   : > { %791 = vst.msk [vmem:[#allocation2] sm:$0xf] %vm790_vm6, %v785_v49 }
 0x410   : > { %v787_v50 = vpop.permute.xlu0 %786 }
 0x411   : > { %792 = vst.msk [vmem:[#allocation2 + $0x4] sm:$0xf] %vm790_vm6, %v787_v50 }
 0x418   : > { %v1011_v6 = vld [vmem:[#allocation2] sm:$0xff] }
 0x419   : > { %1001 = vmatmul.msk.bf16.vlgmr.msra.gmra.mxu0 %vm277_vm0, %v1011_v6 }
 0x496   : > { %v832_v51 = vpop.f32.mrf.mxu0 }
 0x497   : > { %v833_v52 = vadd.f32 %v1099_v10, %v832_v51 }
 0x499   : > { %837 = vst.msk [vmem:[%s250_s6] sm:$0xff] %vm277_vm0, %v833_v52 }
 0x49e   : > { %v834_v53 = vpop.f32.mrf.mxu0 }
 0x49f   : > { %v835_v54 = vadd.f32 %v1099_v10, %v834_v53 }
 0x4a1   : > { %838 = vst.msk [vmem:[%s250_s6 + $0x8] sm:$0xff] %vm277_vm0, %v835_v54 }
 0x4a2   : > { %1249 = shalt.err (!%p1246_p10)
}
 0x4a3   : > { %s1312_s20 = smov 128  }
 0x4a4   : > { %1025 = dma.vmem_to_hbm [thread:$0]  (%p1410_p3), %s853_s8, 256, %s855_s9, %s840_s24, %s1312_s20, %s1312_s20, %s1309_s27  }
 0x4a5 PF: > { %s869_s21 = sand.u32 1, %s1280_s15   ;;  %p1615_p12 = scmp.ge.s32.totalorder %s1292_s18, 2 }
 0x4a6   : > { %s870_s26 = scalar_lea.sflag [#allocation5], %s869_s21 }
 0x4a7   : > { %p1039_p13 = pnand %p1615_p12, %p1373_p6 }
 0x4a9   : > { %p1040_p0 = pneg %p1039_p13 }
 0x4ab   : > { %1275 = dma.done.wait (%p1040_p0), %s870_s26, 256  }
 0x4ac   : > { %1277 = vsyncadd (%p1040_p0), %s870_s26, 4294967040  ;;  %p18_p5 = scmp.ge.s32.totalorder %s1400_s10, 4   ;;  %s1616_s15 = smov %s1284_s16 }
 0x4ad   : > { %s1617_s16 = smov %s1288_s17  ;;  %s1618_s17 = smov %s1416_s14 }
 0x4ae   : > { %s1619_s18 = smov %s1400_s10  ;;  %20 = sbr.rel (!%p18_p5) target bundleno = 6 (0x6), region = 89 }
 0x4b3   :  { %876 = vsyncpa [#allocation4], 1 }
 0x4b4   :  { %878 = vsyncpa [#allocation4 + $0x1], 1 }
 0x4b5   :  { %879 = vsyncpa [#allocation7], 1 }
 0x4b6   :  { %880 = vsyncpa [#allocation5], 1 }
 0x4b7   :  { %882 = vsyncpa [#allocation5 + $0x1], 1 }

// kernel: tpu_custom_call.1
= control target key start
LH: loop header
LB: loop body
LE: loop exit
PB: predicated region body
PF: predicated region fallthrough
CT: control target
= control target key end

     0   :  { %9 = vsyncpa [#allocation4], 0  ;;  %s1605_s0 = inlined_call_operand.hbm [shape: bf16[32,32], index: 0, kind: input, shape index: {}]   ;;  %s1606_s1 = inlined_call_operand.hbm [shape: bf16[32,96], index: 1, kind: input, shape index: {}]   ;;  %s1607_s2 = inlined_call_operand.hbm [shape: bf16[32,32], index: 2, kind: input, shape index: {}]   ;;  %s1608_s3 = inlined_call_operand.vmem [shape: f32[1,32], index: 3, kind: input, shape index: {}]   ;;  %s1609_s4 = inlined_call_operand.hbm [shape: f32[32,32], index: 4, kind: output, shape index: {}]  }
   0x1   :  { %11 = vsyncpa [#allocation4 + $0x1], 0 }
   0x2   :  { %12 = vsyncpa [#allocation7], 0 }
   0x3   :  { %13 = vsyncpa [#allocation5], 0 }
   0x4   :  { %15 = vsyncpa [#allocation5 + $0x1], 0  ;;  %s1338_s15 = smov 0   ;;  %s1340_s16 = smov 0  }
   0x5   :  { %s1342_s17 = smov 0   ;;  %s1344_s18 = smov 0  }
   0x6 LB: > { %s1359_s19 = sadd.s32 4294967295, %s1292_s18   ;;  %s947_s20 = sadd.s32 4294967294, %s1292_s18   ;;  %s1292_s18 = sphi %s1344_s18, %s1619_s18   ;;  %s1288_s17 = sphi %s1342_s17, %s1618_s17   ;;  %s1284_s16 = sphi %s1340_s16, %s1617_s16   ;;  %s1280_s15 = sphi %s1338_s15, %s1616_s15  }
   0x7   : > { %p41_p0 = scmp.ne.s32.totalorder %s1284_s16, %s1280_s15  ;;  %p42_p1 = scmp.eq.s32.totalorder %s1359_s19, 0 }
   0x8   : > { %p128_p2 = scmp.eq.s32.totalorder %s1359_s19, 1  ;;  %p134_p3 = scmp.eq.s32.totalorder %s947_s20, 1 }
   0x9   : > { %p1368_p4 = por %p42_p1, %p41_p0  ;;  %p948_p5 = scmp.ge.s32.totalorder %s1292_s18, 1 }
   0xa   : > { %p1373_p6 = por %p134_p3, %p41_p0  ;;  %p141_p7 = scmp.lt.s32.totalorder %s1292_s18, 3 }
   0xb   : > { %s152_s25 = sshll.u32 %s1606_s1, 4  ;;  %s1294_s27 = smov [#allocation6]   ;;  %s153_s25 = int_to_ptr.hbm [resolvable:$true] %s152_s25 }
   0xc   : > { %p1381_p8 = pnand %p948_p5, %p141_p7  ;;  %s154_s28 = sshll.u32 %s1294_s27, 4  ;;  %s155_s28 = int_to_ptr.vmem [resolvable:$true] %s154_s28 }
   0xd   : > { %s166_s5 = sshll.u32 %s1607_s2, 4  ;;  %s1295_s6 = smov 64   ;;  %s167_s5 = int_to_ptr.hbm [resolvable:$true] %s166_s5 }
   0xe   : > { %p1027_p9 = pneg %p1381_p8  ;;  %s1296_s7 = smov 4  }
   0xf   : > { %s1297_s8 = smov [#allocation8]   ;;  %s1400_s10 = sadd.s32 1, %s1292_s18  }
  0x10   : > { %p1028_p10 = pnand %p1027_p9, %p42_p1  ;;  %s168_s9 = sshll.u32 %s1297_s8, 4  ;;  %s169_s9 = int_to_ptr.vmem [resolvable:$true] %s168_s9 }
  0x11   : > { %s28_s11 = sadd.s32 1, %s1288_s17  ;;  %s25_s12 = ssub.s32 %s1292_s18, %s1400_s10 }
  0x12   : > { %1030 = dma.hbm_to_vmem [thread:$0]  (!%p1028_p10), %s153_s25, 256, %s155_s28, [#allocation7], %s1295_s6, %s1295_s6, %s1296_s7  }
  0x13   : > { %1033 = dma.hbm_to_vmem [thread:$0]  (!%p1028_p10), %s167_s5, 256, %s169_s9, [#allocation7], %s1295_s6, %s1295_s6, %s1296_s7  }
  0x14   : > { %p35_p12 = scmp.ne.s32.totalorder %s1288_s17, %s1284_s16  ;;  %p26_p13 = scmp.eq.s32.totalorder %s25_s12, 0 }
  0x15   : > { %p36_p0 = scmp.eq.s32.totalorder %s1292_s18, 0  ;;  %p1044_p5 = scmp.lt.s32.totalorder %s1292_s18, 2 }
  0x16   : > { %p1410_p3 = por %p128_p2, %p35_p12  ;;  %s185_s20 = sand.u32 1, %s1288_s17  }
  0x17   : > { %s1416_s14 = scalar_select %p26_p13, %s1288_s17, %s28_s11  }
  0x18   : > { %p37_p7 = por %p36_p0, %p35_p12  ;;  %s952_s23 = sshll.u32 %s185_s20, 3 }
  0x19   : > { %s1007_s24 = sshll.u32 %s1292_s18, 3  ;;  %s189_s29 = scalar_lea.vmem [#allocation3], %s952_s23 }
  0x1a   : > { %s194_s28 = scalar_lea.hbm %s1605_s0, %s1007_s24  ;;  %s197_s30 = sshll.u32 %s189_s29, 4  ;;  %s198_s30 = int_to_ptr.vmem [resolvable:$true] %s197_s30 }
  0x1b   : > { %s195_s5 = sshll.u32 %s194_s28, 4  ;;  %p1423_p2 = pnand %p1044_p5, %p37_p7  ;;  %s196_s5 = int_to_ptr.hbm [resolvable:$true] %s195_s5 }
  0x1c   : > { %s186_s9 = scalar_lea.sflag [#allocation4], %s185_s20  ;;  %s1192_s11 = sshra.s32 %s196_s5, 4  ;;  %s1193_s11 = int_to_ptr.hbm [resolvable:$true] %s1192_s11 }
  0x1d   : > { %s1194_s12 = scalar_lea.hbm %s1193_s11, 8  ;;  %p1196_p10 = pneg %p1423_p2 }
  0x1e   : > { %p1195_p9 = scmp.ne.s32.totalorder %s1193_s11, %s1194_s12  ;;  %s1199_s25 = scalar_lea.hbm %s1605_s0, 16 }
  0x1f   : > { %p1200_p0 = scmp.lt.s32.totalorder %s1193_s11, %s1605_s0  ;;  %p1201_p5 = scmp.lt.s32.totalorder %s1199_s25, %s1194_s12 }
  0x20   : > { %p1197_p12 = pnand %p1196_p10, %p1195_p9 }
  0x21   : > { %p1202_p7 = por %p1201_p5, %p1200_p0 }
  0x22   : > { %p1198_p13 = pneg %p1197_p12 }
  0x24   : > { %p1203_p11 = pnand %p1202_p7, %p1198_p13 }
  0x26   : > { %1206 = shalt.err (!%p1203_p11)
}
  0x27   : > { %1037 = dma.hbm_to_vmem [thread:$0]  (!%p1423_p2), %s196_s5, 128, %s198_s30, %s186_s9, %s1295_s6, %s1295_s6, %s1296_s7  }
  0x28   : > { %209 = sbr.rel (%p1381_p8) target bundleno = 1189 (0x4a5), region = 36  ;;  %s1443_s20 = sand.u32 (!%p1381_p8), 1, %s1284_s16  }
  0x29   : > { %s956_s29 = sshll.u32 (!%p1381_p8), %s1443_s20, 3  ;;  %s212_s11 = scalar_lea.sflag (!%p1381_p8), [#allocation4], %s1443_s20 }
  0x2a   : > { %s215_s12 = scalar_lea.vmem (!%p1381_p8), [#allocation3], %s956_s29 }
  0x2d   : > { %1267 = dma.done.wait (%p1368_p4), %s212_s11, 128  }
  0x2e   : > { %1269 = vsyncadd (%p1368_p4), %s212_s11, 4294967168 }
  0x2f   : > { %1271 = dma.done.wait (%p42_p1), [#allocation7], 512  }
  0x30   : > { %1273 = vsyncadd (%p42_p1), [#allocation7], 4294966784  ;;  %v1010_v0 = vld [vmem:[#allocation6 + $0x8] sm:$0xff]  ;;  %v1009_v1 = vld [vmem:[#allocation6] sm:$0xff]  ;;  %vm277_vm0 = vcmask 261120   ;;  %s1298_s21 = smov 120  }
  0x31   : > { %287 = vmatpush.bf16.msra.mxu0 %v1010_v0  ;;  %v1008_v2 = vld [vmem:[%s215_s12] sm:$0xff]  ;;  %s1299_s26 = smov 88   ;;  %s1300_s6 = smov 96   ;;  %vm302_vm1 = vcmask 64512   ;;  %vm375_vm2 = vcmask 1043456   ;;  %vm415_vm3 = vcmask 60416  }
  0x32   : > { %s1301_s7 = smov 112   ;;  %s1302_s30 = smov 80   ;;  %vm540_vm4 = vcmask 126016   ;;  %vm665_vm5 = vcmask 191616   ;;  %vm790_vm6 = vcmask 257216  }
  0x33   : > { %s1303_s5 = smov 72   ;;  %s1304_s8 = smov 104  }
  0x34   : > { %s1305_s9 = smov 64   ;;  %s1306_s24 = smov 56  }
  0x35   : > { %288 = vmatpush.bf16.msra.mxu0 %v1009_v1  ;;  %s1307_s23 = smov 48   ;;  %s1308_s25 = smov 40  }
  0x36   : > { %s1309_s27 = smov 8   ;;  %s1310_s28 = smov 16  }
  0x37   : > { %s1311_s29 = smov 24   ;;  %s959_s11 = sshll.u32 %s1443_s20, 4 }
  0x38   : > { %972 = vmatmul.msk.bf16.vlgmr.msra.gmra.mxu0 %vm277_vm0, %v1008_v2 }
  0xb5   : > { %v290_v3 = vpop.f32.mrf.mxu0 }
  0xb6   : > { %v295_v4 = vpack.c.bf16 %v290_v3, %v290_v3 }
  0xb8   : > { %v298_v5 = vunpack.c.l.b16 %v295_v4 }
  0xba   : > { %v1456_v6 = vpack.c.b16 %v298_v5, %v298_v5 }
  0xbc   : > { %418 = vrot.lane.b32.xlu2 %v1456_v6, %s1298_s21  ;;  %420 = vrot.lane.b32.xlu1 %v1456_v6, %s1299_s26 }
  0xbd   : > { %300 = vrot.lane.b32.xlu0 %v1456_v6, %s1300_s6  ;;  %v292_v7 = vpop.f32.mrf.mxu0 }
  0xbe   : > { %v296_v8 = vpack.c.bf16 %v292_v7, %v292_v7 }
  0xc0   : > { %v323_v9 = vunpack.c.l.b16 %v296_v8 }
  0xc2   : > { %v1461_v10 = vpack.c.b16 %v323_v9, %v323_v9 }
  0xc4   : > { %441 = vrot.lane.b32.xlu2 %v1461_v10, %s1298_s21  ;;  %443 = vrot.lane.b32.xlu1 %v1461_v10, %s1299_s26  ;;  %s1014_s26 = sshll.u32 %s1359_s19, 4 }
  0xc5   : > { %325 = vrot.lane.b32.xlu0 %v1461_v10, %s1300_s6  ;;  %s250_s6 = scalar_lea.vmem [#allocation9], %s959_s11 }
  0xcc   : > { %543 = vrot.lane.b32.xlu2 %v1456_v6, %s1301_s7  ;;  %568 = vrot.lane.b32.xlu1 %v1461_v10, %s1302_s30 }
  0xcd   : > { %545 = vrot.lane.b32.xlu0 %v1456_v6, %s1302_s30 }
  0xd4   : > { %693 = vrot.lane.b32.xlu2 %v1461_v10, %s1303_s5  ;;  %670 = vrot.lane.b32.xlu1 %v1456_v6, %s1303_s5  ;;  %s851_s5 = scalar_lea.hbm %s1609_s4, %s1014_s26 }
  0xd5   : > { %566 = vrot.lane.b32.xlu0 %v1461_v10, %s1301_s7 }
  0xdc   : > { %691 = vrot.lane.b32.xlu1 %v1461_v10, %s1304_s8 }
  0xdd   : > { %668 = vrot.lane.b32.xlu0 %v1456_v6, %s1304_s8  ;;  %s852_s8 = sshll.u32 %s250_s6, 4  ;;  %s853_s8 = int_to_ptr.vmem [resolvable:$true] %s852_s8 }
 0x116   : > { %v419_v11 = vpop.permute.xlu2 %418 }
 0x11e   : > { %v442_v16 = vpop.permute.xlu2 %441 }
 0x126   : > { %v544_v21 = vpop.permute.xlu2 %543 }
 0x12e   : > { %v421_v12 = vpop.permute.xlu1 %420  ;;  %v694_v26 = vpop.permute.xlu2 %693 }
 0x12f   : > { %v301_v13 = vpop.permute.xlu0 %300  ;;  %v426_v14 = vsel %vm302_vm1, %v421_v12, 0  ;;  %v699_v29 = vsel %vm302_vm1, %v694_v26, 0 }
 0x130   : > { %v307_v15 = vsel %vm302_vm1, %v301_v13, 0  ;;  %435 = vmatpush.bf16.xpose.msrb.mxu0 %v426_v14 }
 0x131   : > { %316 = vmatpush.bf16.xpose.msra.mxu1 %v307_v15 }
 0x136   : > { %v444_v17 = vpop.permute.xlu1 %443 }
 0x137   : > { %v326_v18 = vpop.permute.xlu0 %325  ;;  %977 = vmatmul.msk.bf16.vlgmr.msrb.gmra.mxu0 %vm302_vm1, %v419_v11  ;;  %v449_v19 = vsel %vm302_vm1, %v444_v17, 0 }
 0x138   : > { %973 = vmatmul.msk.bf16.vlgmr.msra.gmra.mxu1 %vm302_vm1, %v295_v4  ;;  %v331_v20 = vsel %vm302_vm1, %v326_v18, 0 }
 0x139   : > { %340 = vmatpush.bf16.xpose.msra.mxu2 %v331_v20  ;;  %458 = vmatpush.bf16.xpose.msrb.mxu1 %v449_v19 }
 0x13e   : > { %v569_v22 = vpop.permute.xlu1 %568 }
 0x13f   : > { %v574_v23 = vsel %vm302_vm1, %v569_v22, 0  ;;  %v546_v24 = vpop.permute.xlu0 %545 }
 0x140   : > { %v551_v25 = vsel %vm302_vm1, %v546_v24, 0  ;;  %974 = vmatmul.msk.bf16.vlgmr.msra.gmra.mxu2 %vm302_vm1, %v296_v8 }
 0x141   : > { %583 = vmatpush.bf16.xpose.msra.mxu1 %v574_v23  ;;  %560 = vmatpush.bf16.xpose.msra.mxu0 %v551_v25 }
 0x146   : > { %v671_v27 = vpop.permute.xlu1 %670 }
 0x147   : > { %v676_v28 = vsel %vm302_vm1, %v671_v27, 0  ;;  %v567_v30 = vpop.permute.xlu0 %566 }
 0x148   : > { %978 = vmatmul.msk.bf16.vlgmr.msrb.gmra.mxu1 %vm302_vm1, %v442_v16  ;;  %981 = vmatmul.msk.bf16.vlgmr.msra.gmra.mxu0 %vm302_vm1, %v544_v21 }
 0x149   : > { %708 = vmatpush.bf16.xpose.msrb.mxu1 %v699_v29  ;;  %685 = vmatpush.bf16.xpose.msrb.mxu0 %v676_v28 }
 0x14e   : > { %v692_v32 = vpop.permute.xlu1 %691 }
 0x14f   : > { %v669_v31 = vpop.permute.xlu0 %668 }
 0x158   : > { %982 = vmatmul.msk.bf16.vlgmr.msra.gmra.mxu1 %vm302_vm1, %v567_v30  ;;  %985 = vmatmul.msk.bf16.vlgmr.msrb.gmra.mxu0 %vm302_vm1, %v669_v31 }
 0x168   : > { %986 = vmatmul.msk.bf16.vlgmr.msrb.gmra.mxu1 %vm302_vm1, %v692_v32 }
 0x1b4   : > { %v437_v33 = vpop.f32.mrf.mxu0 }
 0x1b5   : > { %v318_v34 = vpop.f32.mrf.mxu1  ;;  %v464_v35 = vsel %vm302_vm1, %v437_v33, -inf }
 0x1b6   : > { %v346_v36 = vsel %vm302_vm1, %v318_v34, -inf  ;;  %465 = vmax.xlane.f32.xlu1 %v464_v35 }
 0x1b7   : > { %347 = vmax.xlane.f32.xlu2 %v346_v36 }
 0x1bc   : > { %v439_v37 = vpop.f32.mrf.mxu0 }
 0x1bd   : > { %v320_v38 = vpop.f32.mrf.mxu1 }
 0x1c3   : > { %v342_v39 = vpop.f32.mrf.mxu2 }
 0x1c4   : > { %v349_v40 = vsel %vm302_vm1, %v342_v39, -inf }
 0x1c5   : > { %v460_v41 = vpop.f32.mrf.mxu1  ;;  %350 = vmax.xlane.f32.xlu0 %v349_v40  ;;  %v1493_v42 = vpop.f32.mrf.mxu0 }
 0x1c6   : > { %v467_v43 = vsel %vm302_vm1, %v460_v41, -inf  ;;  %v589_v55 = vsel %vm302_vm1, %v1493_v42, -inf }
 0x1c7   : > { %468 = vmax.xlane.f32.xlu2 %v467_v43 }
 0x1cb   : > { %v344_v44 = vpop.f32.mrf.mxu2 }
 0x1cd   : > { %v462_v45 = vpop.f32.mrf.mxu1  ;;  %v564_v46 = vpop.f32.mrf.mxu0 }
 0x1cf   : > { %392 = vrot.lane.b32.xlu1 %v1461_v10, %s1305_s9 }
 0x1d5   : > { %v1497_v47 = vpop.f32.mrf.mxu1  ;;  %v1499_v48 = vpop.f32.mrf.mxu0 }
 0x1d6   : > { %v592_v54 = vsel %vm302_vm1, %v1497_v47, -inf  ;;  %v714_v56 = vsel %vm302_vm1, %v1499_v48, -inf }
 0x1d7   : > { %509 = vrot.lane.b32.xlu1 %v1461_v10, %s1306_s24 }
 0x1d9   : > { %488 = vrot.lane.b32.xlu0 %v1456_v6, %s1306_s24  ;;  %s840_s24 = scalar_lea.sflag [#allocation5], %s1443_s20 }
 0x1dd   : > { %v587_v49 = vpop.f32.mrf.mxu1  ;;  %v689_v50 = vpop.f32.mrf.mxu0 }
 0x1df   : > { %370 = vrot.lane.b32.xlu2 %v1456_v6, %s1305_s9  ;;  %s854_s9 = sshll.u32 %s851_s5, 4  ;;  %s855_s9 = int_to_ptr.hbm [resolvable:$true] %s854_s9 }
 0x1e5   : > { %v710_v51 = vpop.f32.mrf.mxu1 }
 0x1e6   : > { %v717_v53 = vsel %vm302_vm1, %v710_v51, -inf }
 0x1ed   : > { %v712_v52 = vpop.f32.mrf.mxu1 }
 0x201   : > { %718 = vmax.xlane.f32.xlu1 %v717_v53 }
 0x203   : > { %593 = vmax.xlane.f32.xlu0 %v592_v54 }
 0x208   : > { %590 = vmax.xlane.f32.xlu2 %v589_v55 }
 0x20b   : > { %715 = vmax.xlane.f32.xlu0 %v714_v56 }
 0x229   : > { %v466_v57 = vpop.xlane.xlu1 %465 }
 0x22a   : > { %v348_v58 = vpop.xlane.xlu2 %347  ;;  %v470_v59 = vsub.f32 %v437_v33, %v466_v57 }
 0x22b   : > { %v352_v60 = vsub.f32 %v318_v34, %v348_v58 }
 0x22c   : > { %v472_v61 = vmul.f32 1.442695, %v470_v59 }
 0x22d   : > { %v354_v62 = vmul.f32 1.442695, %v352_v60 }
 0x22e   : > { %1100 = vpow2.f32 %v472_v61 }
 0x22f   : > { %1102 = vpow2.f32 %v354_v62 }
 0x234   : > { %v1511_v63 = vpop.eup %1100 }
 0x235   : > { %v1513_v0 = vpop.eup %1102  ;;  %v476_v1 = vsel %vm302_vm1, %v1511_v63, 0.0 }
 0x236   : > { %v358_v2 = vsel %vm302_vm1, %v1513_v0, 0.0  ;;  %477 = vadd.xlane.f32.xlu0 %v476_v1 }
 0x237   : > { %359 = vadd.xlane.f32.xlu1 %v358_v2 }
 0x238   : > { %v351_v3 = vpop.xlane.xlu0 %350 }
 0x239   : > { %v353_v4 = vsub.f32 %v342_v39, %v351_v3 }
 0x23a   : > { %v469_v5 = vpop.xlane.xlu2 %468 }
 0x23b   : > { %v356_v7 = vmul.f32 1.442695, %v353_v4  ;;  %v471_v8 = vsub.f32 %v460_v41, %v469_v5 }
 0x23d   : > { %1104 = vpow2.f32 %v356_v7  ;;  %v474_v9 = vmul.f32 1.442695, %v471_v8 }
 0x23f   : > { %1106 = vpow2.f32 %v474_v9 }
 0x241   : > { %v393_v11 = vpop.permute.xlu1 %392 }
 0x242   : > { %v371_v12 = vpop.permute.xlu2 %370  ;;  %v398_v13 = vsel %vm375_vm2, %v393_v11, 0 }
 0x243   : > { %v1520_v14 = vpop.eup %1104  ;;  %v377_v15 = vsel %vm375_vm2, %v371_v12, 0 }
 0x244   : > { %386 = vmatpush.bf16.msra.mxu3 %v377_v15  ;;  %v361_v16 = vsel %vm302_vm1, %v1520_v14, 0.0 }
 0x245   : > { %v1525_v17 = vpop.eup %1106  ;;  %362 = vadd.xlane.f32.xlu0 %v361_v16 }
 0x246   : > { %v479_v18 = vsel %vm302_vm1, %v1525_v17, 0.0 }
 0x247   : > { %480 = vadd.xlane.f32.xlu2 %v479_v18 }
 0x248   : > { %407 = vmatpush.bf16.msrb.mxu3 %v398_v13 }
 0x249   : > { %v510_v21 = vpop.permute.xlu1 %509 }
 0x24a   : > { %v515_v50 = vsel %vm375_vm2, %v510_v21, 0 }
 0x24b   : > { %v489_v19 = vpop.permute.xlu0 %488 }
 0x24c   : > { %v494_v20 = vsel %vm375_vm2, %v489_v19, 0 }
 0x24d   : > { %503 = vmatpush.bf16.msrb.mxu2 %v494_v20 }
 0x250   : > { %634 = vrot.lane.b32.xlu1 %v1461_v10, %s1307_s23 }
 0x25f   : > { %613 = vrot.lane.b32.xlu2 %v1456_v6, %s1307_s23  ;;  %s1236_s23 = sshra.s32 %s855_s9, 4  ;;  %s1237_s23 = int_to_ptr.hbm [resolvable:$true] %s1236_s23 }
 0x260   : > { %s1238_s19 = scalar_lea.hbm %s1237_s23, 16  ;;  %p1243_p11 = scmp.lt.s32.totalorder %s1237_s23, %s1609_s4 }
 0x261   : > { %p1239_p1 = scmp.ne.s32.totalorder %s1237_s23, %s1238_s19 }
 0x263   : > { %p1240_p4 = pnand %p1239_p1, %p1410_p3 }
 0x265   : > { %p1241_p8 = pneg %p1240_p4 }
 0x274   : > { %v719_v22 = vpop.xlane.xlu1 %718 }
 0x275   : > { %v721_v23 = vsub.f32 %v710_v51, %v719_v22 }
 0x276   : > { %v594_v24 = vpop.xlane.xlu0 %593 }
 0x277   : > { %v596_v25 = vsub.f32 %v1497_v47, %v594_v24  ;;  %v724_v27 = vmul.f32 1.442695, %v721_v23 }
 0x279   : > { %v599_v26 = vmul.f32 1.442695, %v596_v25 }
 0x27b   : > { %1108 = vpow2.f32 %v599_v26  ;;  %v591_v28 = vpop.xlane.xlu2 %590 }
 0x27c   : > { %v595_v29 = vsub.f32 %v1493_v42, %v591_v28  ;;  %1110 = vpow2.f32 %v724_v27 }
 0x27e   : > { %v597_v30 = vmul.f32 1.442695, %v595_v29  ;;  %v716_v31 = vpop.xlane.xlu0 %715 }
 0x27f   : > { %v720_v32 = vsub.f32 %v1499_v48, %v716_v31 }
 0x280   : > { %1112 = vpow2.f32 %v597_v30 }
 0x281   : > { %v1109_v33 = vpop.eup %1108  ;;  %v722_v34 = vmul.f32 1.442695, %v720_v32 }
 0x282   : > { %v604_v35 = vsel %vm302_vm1, %v1109_v33, 0.0  ;;  %v1536_v36 = vpop.eup %1110 }
 0x283   : > { %1114 = vpow2.f32 %v722_v34  ;;  %605 = vadd.xlane.f32.xlu0 %v604_v35  ;;  %v729_v39 = vsel %vm302_vm1, %v1536_v36, 0.0 }
 0x286   : > { %v1113_v37 = vpop.eup %1112 }
 0x287   : > { %v601_v38 = vsel %vm302_vm1, %v1113_v37, 0.0 }
 0x288   : > { %602 = vadd.xlane.f32.xlu1 %v601_v38  ;;  %730 = vadd.xlane.f32.xlu2 %v729_v39 }
 0x289   : > { %v1115_v40 = vpop.eup %1114 }
 0x28a   : > { %v726_v41 = vsel %vm302_vm1, %v1115_v40, 0.0 }
 0x28b   : > { %727 = vadd.xlane.f32.xlu0 %v726_v41 }
 0x29f   : > { %738 = vrot.lane.b32.xlu0 %v1456_v6, %s1308_s25 }
 0x2a1   : > { %759 = vrot.lane.b32.xlu1 %v1461_v10, %s1308_s25 }
 0x2a9   : > { %v478_v42 = vpop.xlane.xlu0 %477 }
 0x2aa   : > { %v360_v43 = vpop.xlane.xlu1 %359  ;;  %1116 = vrcp.f32 %v478_v42 }
 0x2ab   : > { %1118 = vrcp.f32 %v360_v43 }
 0x2b0   : > { %v1117_v44 = vpop.eup %1116 }
 0x2b1   : > { %v1119_v45 = vpop.eup %1118  ;;  %v484_v46 = vmul.f32 %v1117_v44, %v1511_v63 }
 0x2b2   : > { %v366_v47 = vmul.f32 %v1119_v45, %v1513_v0  ;;  %v1013_v45 = vld [vmem:[#allocation8 + $0x8] sm:$0xff] }
 0x2b3   : > { %v486_v48 = vpack.c.bf16 %v484_v46, %v484_v46  ;;  %829 = vmatpush.bf16.msra.mxu0 %v1013_v45  ;;  %v1012_v46 = vld [vmem:[#allocation8] sm:$0xff] }
 0x2b4   : > { %v368_v49 = vpack.c.bf16 %v366_v47, %v366_v47 }
 0x2b5   : > { %979 = vmatmul.msk.bf16.vlgmr.msrb.gmra.mxu2 %vm302_vm1, %v486_v48 }
 0x2b6   : > { %975 = vmatmul.msk.bf16.vlgmr.msra.gmra.mxu3 %vm302_vm1, %v368_v49 }
 0x2b7   : > { %524 = vmatpush.bf16.msra.mxu3 %v515_v50  ;;  %830 = vmatpush.bf16.msra.mxu0 %v1012_v46 }
 0x2b8   : > { %v363_v6 = vpop.xlane.xlu0 %362 }
 0x2b9   : > { %1120 = vrcp.f32 %v363_v6 }
 0x2ba   : > { %v481_v10 = vpop.xlane.xlu2 %480 }
 0x2bb   : > { %1122 = vrcp.f32 %v481_v10  ;;  %v1099_v10 = vld [vmem:[%s1608_s3] ss:$0 sm:$0xff] }
 0x2bf   : > { %v1121_v51 = vpop.eup %1120 }
 0x2c0   : > { %v367_v52 = vmul.f32 %v1121_v51, %v1520_v14 }
 0x2c1   : > { %v1123_v58 = vpop.eup %1122 }
 0x2c2   : > { %v614_v53 = vpop.permute.xlu2 %613  ;;  %v635_v55 = vpop.permute.xlu1 %634  ;;  %v369_v56 = vpack.c.bf16 %v367_v52, %v367_v52  ;;  %v485_v59 = vmul.f32 %v1123_v58, %v1525_v17 }
 0x2c3   : > { %v619_v54 = vsel %vm375_vm2, %v614_v53, 0  ;;  %v640_v57 = vsel %vm375_vm2, %v635_v55, 0 }
 0x2c4   : > { %628 = vmatpush.bf16.msra.mxu2 %v619_v54  ;;  %v487_v60 = vpack.c.bf16 %v485_v59, %v485_v59 }
 0x2c6   : > { %976 = vmatmul.msk.bf16.vlgmr.msrb.gmra.mxu3 %vm302_vm1, %v369_v56 }
 0x2c7   : > { %649 = vmatpush.bf16.msrb.mxu3 %v640_v57 }
 0x2d6   : > { %980 = vmatmul.msk.bf16.vlgmr.msra.gmra.mxu3 %vm302_vm1, %v487_v60 }
 0x2f6   : > { %v606_v61 = vpop.xlane.xlu0 %605 }
 0x2f7   : > { %1124 = vrcp.f32 %v606_v61 }
 0x2fb   : > { %v603_v62 = vpop.xlane.xlu1 %602  ;;  %v731_v4 = vpop.xlane.xlu2 %730 }
 0x2fc   : > { %1126 = vrcp.f32 %v603_v62 }
 0x2fd   : > { %v1125_v63 = vpop.eup %1124  ;;  %1128 = vrcp.f32 %v731_v4 }
 0x2fe   : > { %v610_v0 = vmul.f32 %v1125_v63, %v1109_v33  ;;  %v728_v7 = vpop.xlane.xlu0 %727 }
 0x2ff   : > { %1130 = vrcp.f32 %v728_v7 }
 0x300   : > { %v612_v1 = vpack.c.bf16 %v610_v0, %v610_v0 }
 0x302   : > { %984 = vmatmul.msk.bf16.vlgmr.msrb.gmra.mxu3 %vm302_vm1, %v612_v1  ;;  %v1127_v2 = vpop.eup %1126 }
 0x303   : > { %v609_v3 = vmul.f32 %v1127_v2, %v1113_v37  ;;  %v1129_v8 = vpop.eup %1128 }
 0x304   : > { %v735_v12 = vmul.f32 %v1129_v8, %v1536_v36 }
 0x305   : > { %v611_v5 = vpack.c.bf16 %v609_v3, %v609_v3  ;;  %v1131_v9 = vpop.eup %1130 }
 0x306   : > { %v734_v13 = vmul.f32 %v1131_v9, %v1115_v40  ;;  %v737_v17 = vpack.c.bf16 %v735_v12, %v735_v12 }
 0x307   : > { %983 = vmatmul.msk.bf16.vlgmr.msra.gmra.mxu2 %vm302_vm1, %v611_v5 }
 0x308   : > { %v736_v18 = vpack.c.bf16 %v734_v13, %v734_v13 }
 0x311   : > { %v739_v11 = vpop.permute.xlu0 %738 }
 0x312   : > { %v744_v14 = vsel %vm375_vm2, %v739_v11, 0 }
 0x313   : > { %v760_v15 = vpop.permute.xlu1 %759  ;;  %753 = vmatpush.bf16.msrb.mxu2 %v744_v14 }
 0x314   : > { %v765_v16 = vsel %vm375_vm2, %v760_v15, 0 }
 0x315   : > { %774 = vmatpush.bf16.msra.mxu3 %v765_v16 }
 0x317   : > { %987 = vmatmul.msk.bf16.vlgmr.msrb.gmra.mxu2 %vm302_vm1, %v736_v18 }
 0x318   : > { %988 = vmatmul.msk.bf16.vlgmr.msra.gmra.mxu3 %vm302_vm1, %v737_v17 }
 0x338   : > { %v505_v19 = vpop.f32.mrf.mxu2 }
 0x339   : > { %v388_v20 = vpop.f32.mrf.mxu3  ;;  %v530_v21 = vpack.c.bf16 %v505_v19, %v505_v19 }
 0x33a   : > { %v413_v22 = vpack.c.bf16 %v388_v20, %v388_v20 }
 0x33b   : > { %534 = vrot.lane.b32.xlu0 %v530_v21, %s1309_s27 }
 0x33c   : > { %416 = vst.msk [vmem:[#allocation2] sm:$0xf] %vm415_vm3, %v413_v22 }
 0x340   : > { %v507_v23 = vpop.f32.mrf.mxu2 }
 0x341   : > { %v390_v24 = vpop.f32.mrf.mxu3 }
 0x349   : > { %v409_v25 = vpop.f32.mrf.mxu3 }
 0x34a   : > { %v414_v26 = vpack.c.bf16 %v409_v25, %v409_v25 }
 0x34c   : > { %417 = vst.msk [vmem:[#allocation2 + $0x4] sm:$0xf] %vm415_vm3, %v414_v26 }
 0x351   : > { %v411_v27 = vpop.f32.mrf.mxu3 }
 0x359   : > { %v526_v28 = vpop.f32.mrf.mxu3 }
 0x35a   : > { %v531_v29 = vpack.c.bf16 %v526_v28, %v526_v28 }
 0x35c   : > { %536 = vrot.lane.b32.xlu1 %v531_v29, %s1309_s27 }
 0x361   : > { %v528_v30 = vpop.f32.mrf.mxu3 }
 0x385   : > { %v651_v31 = vpop.f32.mrf.mxu3 }
 0x386   : > { %v656_v32 = vpack.c.bf16 %v651_v31, %v651_v31 }
 0x388   : > { %661 = vrot.lane.b32.xlu1 %v656_v32, %s1310_s28 }
 0x38a   : > { %v630_v33 = vpop.f32.mrf.mxu2 }
 0x38b   : > { %v655_v34 = vpack.c.bf16 %v630_v33, %v630_v33 }
 0x38d   : > { %v653_v35 = vpop.f32.mrf.mxu3  ;;  %659 = vrot.lane.b32.xlu0 %v655_v34, %s1310_s28 }
 0x392   : > { %v632_v36 = vpop.f32.mrf.mxu2 }
 0x39a   : > { %v755_v37 = vpop.f32.mrf.mxu2 }
 0x39b   : > { %v776_v38 = vpop.f32.mrf.mxu3  ;;  %v780_v39 = vpack.c.bf16 %v755_v37, %v755_v37 }
 0x39c   : > { %v781_v40 = vpack.c.bf16 %v776_v38, %v776_v38 }
 0x39d   : > { %784 = vrot.lane.b32.xlu2 %v780_v39, %s1311_s29 }
 0x39e   : > { %786 = vrot.lane.b32.xlu0 %v781_v40, %s1311_s29  ;;  %s1242_s29 = scalar_lea.hbm %s1609_s4, 32 }
 0x39f   : > { %p1244_p2 = scmp.lt.s32.totalorder %s1242_s29, %s1238_s19 }
 0x3a1   : > { %p1245_p9 = por %p1244_p2, %p1243_p11 }
 0x3a2   : > { %v757_v41 = vpop.f32.mrf.mxu2 }
 0x3a3   : > { %v778_v42 = vpop.f32.mrf.mxu3  ;;  %p1246_p10 = pnand %p1245_p9, %p1241_p8 }
 0x3ad   : > { %v535_v43 = vpop.permute.xlu0 %534 }
 0x3ae   : > { %541 = vst.msk [vmem:[#allocation2] sm:$0xf] %vm540_vm4, %v535_v43 }
 0x3ce   : > { %v537_v44 = vpop.permute.xlu1 %536 }
 0x3cf   : > { %542 = vst.msk [vmem:[#allocation2 + $0x4] sm:$0xf] %vm540_vm4, %v537_v44 }
 0x3f7   : > { %v785_v49 = vpop.permute.xlu2 %784 }
 0x3fa   : > { %v662_v47 = vpop.permute.xlu1 %661 }
 0x3fb   : > { %667 = vst.msk [vmem:[#allocation2 + $0x4] sm:$0xf] %vm665_vm5, %v662_v47 }
 0x3ff   : > { %v660_v48 = vpop.permute.xlu0 %659 }
 0x400   : > { %666 = vst.msk [vmem:[#allocation2] sm:$0xf] %vm665_vm5, %v660_v48 }
 0x401   : > { %791 = vst.msk [vmem:[#allocation2] sm:$0xf] %vm790_vm6, %v785_v49 }
 0x410   : > { %v787_v50 = vpop.permute.xlu0 %786 }
 0x411   : > { %792 = vst.msk [vmem:[#allocation2 + $0x4] sm:$0xf] %vm790_vm6, %v787_v50 }
 0x418   : > { %v1011_v6 = vld [vmem:[#allocation2] sm:$0xff] }
 0x419   : > { %1001 = vmatmul.msk.bf16.vlgmr.msra.gmra.mxu0 %vm277_vm0, %v1011_v6 }
 0x496   : > { %v832_v51 = vpop.f32.mrf.mxu0 }
 0x497   : > { %v833_v52 = vadd.f32 %v1099_v10, %v832_v51 }
 0x499   : > { %837 = vst.msk [vmem:[%s250_s6] sm:$0xff] %vm277_vm0, %v833_v52 }
 0x49e   : > { %v834_v53 = vpop.f32.mrf.mxu0 }
 0x49f   : > { %v835_v54 = vadd.f32 %v1099_v10, %v834_v53 }
 0x4a1   : > { %838 = vst.msk [vmem:[%s250_s6 + $0x8] sm:$0xff] %vm277_vm0, %v835_v54 }
 0x4a2   : > { %1249 = shalt.err (!%p1246_p10)
}
 0x4a3   : > { %s1312_s20 = smov 128  }
 0x4a4   : > { %1025 = dma.vmem_to_hbm [thread:$0]  (%p1410_p3), %s853_s8, 256, %s855_s9, %s840_s24, %s1312_s20, %s1312_s20, %s1309_s27  }
 0x4a5 PF: > { %s869_s21 = sand.u32 1, %s1280_s15   ;;  %p1615_p12 = scmp.ge.s32.totalorder %s1292_s18, 2 }
 0x4a6   : > { %s870_s26 = scalar_lea.sflag [#allocation5], %s869_s21 }
 0x4a7   : > { %p1039_p13 = pnand %p1615_p12, %p1373_p6 }
 0x4a9   : > { %p1040_p0 = pneg %p1039_p13 }
 0x4ab   : > { %1275 = dma.done.wait (%p1040_p0), %s870_s26, 256  }
 0x4ac   : > { %1277 = vsyncadd (%p1040_p0), %s870_s26, 4294967040  ;;  %p18_p5 = scmp.ge.s32.totalorder %s1400_s10, 4   ;;  %s1616_s15 = smov %s1284_s16 }
 0x4ad   : > { %s1617_s16 = smov %s1288_s17  ;;  %s1618_s17 = smov %s1416_s14 }
 0x4ae   : > { %s1619_s18 = smov %s1400_s10  ;;  %20 = sbr.rel (!%p18_p5) target bundleno = 6 (0x6), region = 89 }
 0x4b3   :  { %876 = vsyncpa [#allocation4], 1 }
 0x4b4   :  { %878 = vsyncpa [#allocation4 + $0x1], 1 }
 0x4b5   :  { %879 = vsyncpa [#allocation7], 1 }
 0x4b6   :  { %880 = vsyncpa [#allocation5], 1 }
 0x4b7   :  { %882 = vsyncpa [#allocation5 + $0x1], 1 }

</bundles_post_ra>
